<compile_context>
chip_gen: v6e
topology: v6e:2x2x1
jax: 0.10.0
libtpu: 0.0.40
codegen_flags: <defaults>
</compile_context>

<pallas_src>
import functools

import jax
import jax.numpy as jnp
from jax.experimental import pallas as pl
from jax.experimental.pallas import tpu as pltpu


def multidae_kernel(x_ref, w1_ref, b1_ref, w2_ref, b2_ref,
                    w3_ref, b3_ref, w4_ref, b4_ref, z_ref, *, binary_input):
    x = x_ref[...]                                          # bf16 (binary) or f32

    # --- F.normalize folded into a post-matmul row scale ----------------------
    # 1/max(||x||_2, 1e-12) == rsqrt(max(sum(x^2), 1e-24)) (sqrt is monotonic).
    # The row scale commutes with the first matmul, so it is applied to the
    # [bB, HID] product instead of the [bB, N] input.  Accumulate in f32.
    xf = x.astype(jnp.float32)
    if binary_input:
        sumsq = jnp.sum(xf, axis=-1, keepdims=True)         # x in {0,1}: x*x == x
    else:
        sumsq = jnp.sum(xf * xf, axis=-1, keepdims=True)
    inv_norm = jax.lax.rsqrt(jnp.maximum(sumsq, 1e-24))     # EUP

    # dropout: identity in eval mode.

    xb = x.astype(jnp.bfloat16)                             # MXU operand

    # --- encoder: tanh after every Linear (MLPLayers activation='tanh') -------
    h = jnp.dot(xb, w1_ref[...], preferred_element_type=jnp.float32)
    h = jnp.tanh(h * inv_norm + b1_ref[...])                # row scale commutes
    h = jnp.dot(h.astype(jnp.bfloat16), w2_ref[...],
                preferred_element_type=jnp.float32)
    h = jnp.tanh(h + b2_ref[...])

    # --- decoder: tanh after all but the last Linear ---------------------------
    h = jnp.dot(h.astype(jnp.bfloat16), w3_ref[...],
                preferred_element_type=jnp.float32)
    h = jnp.tanh(h + b3_ref[...])
    z = jnp.dot(h.astype(jnp.bfloat16), w4_ref[...],
                preferred_element_type=jnp.float32)
    z_ref[...] = (z + b4_ref[...]).astype(z_ref.dtype)


def _round_up(x, m):
    return (x + m - 1) // m * m


def _pad_to(a, target_shape):
    pads = [(0, t - s) for s, t in zip(a.shape, target_shape)]
    if all(p == (0, 0) for p in pads):
        return a
    return jnp.pad(a, pads)


def _vmem_capacity_bytes():
    try:
        return int(pltpu.get_tpu_info().vmem_capacity_bytes)
    except Exception:
        return 64 << 20  # conservative per-core floor (v7x)


def _resident_spec(shape, single_buffer):
    """Full-array block with a constant index_map -> stays VMEM-resident."""
    nd = len(shape)
    idx_map = lambda i, _n=nd: (0,) * _n
    if single_buffer:
        # Constant index_map => never re-DMAs; double-buffering is pure waste.
        return pl.BlockSpec(shape, idx_map, pipeline_mode=pl.Buffered(1))
    return pl.BlockSpec(shape, idx_map)


def multidae_forward(rating_matrix, params, *, block_b=256, binary_input=True,
                     out_dtype=jnp.float32, single_buffer_weights=True):
    """params: list of 4 (W[d_in, d_out], b[1, d_out]) pairs: enc1, enc2, dec1, dec2."""
    assert len(params) == 4, "kernel is specialized to mlp_hidden_size=[H] (4 Linear layers)"
    B, N = rating_matrix.shape

    # --- zero-pad interior (hidden / latent) dims up to multiples of 128 ------
    # Exact: padded weight rows/cols and bias entries are zero, so the extra
    # activations are tanh(0)=0 and contribute nothing downstream.
    (w1, b1), (w2, b2), (w3, b3), (w4, b4) = params
    hid = w1.shape[1]
    lat = w2.shape[1]
    hid_p = max(128, _round_up(hid, 128))
    lat_p = max(128, _round_up(lat, 128))
    w1 = _pad_to(w1, (N, hid_p));      b1 = _pad_to(b1, (1, hid_p))
    w2 = _pad_to(w2, (hid_p, lat_p));  b2 = _pad_to(b2, (1, lat_p))
    w3 = _pad_to(w3, (lat_p, hid_p));  b3 = _pad_to(b3, (1, hid_p))
    w4 = _pad_to(w4, (hid_p, N))       # b4 stays [1, N]
    padded = [(w1, b1), (w2, b2), (w3, b3), (w4, b4)]

    flat = []
    for w, b in padded:
        flat += [w.astype(jnp.bfloat16), b.astype(jnp.float32)]

    in_bytes = 2 if binary_input else 4
    out_bytes = jnp.dtype(out_dtype).itemsize
    weight_bytes = sum(int(a.size) * a.dtype.itemsize for a in flat)
    w_factor = 1 if single_buffer_weights else 2

    # --- derive the batch tile from the per-generation VMEM budget -------------
    vmem_cap = _vmem_capacity_bytes()
    budget = (vmem_cap * 3) // 4                    # headroom for compiler scratch
    slack = 2 << 20

    # bf16 MXU LHS: keep the tile a multiple of 16 rows (packed sublanes).
    block_b = max(16, min(_round_up(block_b, 16), _round_up(B, 16)))
    tile_bytes = lambda bb: 2 * bb * N * (in_bytes + out_bytes)  # double-buffered x/z
    while block_b > 16 and w_factor * weight_bytes + tile_bytes(block_b) + slack > budget:
        block_b -= 16
    needed = w_factor * weight_bytes + tile_bytes(block_b) + slack
    vmem_limit = int(min(vmem_cap, max(needed + (4 << 20), 32 << 20)))

    Bp = _round_up(B, block_b)
    x = rating_matrix.astype(jnp.bfloat16 if binary_input else jnp.float32)
    if Bp != B:
        x = jnp.pad(x, ((0, Bp - B), (0, 0)))  # zero rows: finite math, sliced off below

    # --- cost estimate (byte counts reflect bf16 streaming) --------------------
    flops = 0
    transcendentals = 0
    bytes_accessed = Bp * N * (in_bytes + out_bytes)
    for idx, (w, _) in enumerate(padded):
        d_in, d_out = w.shape
        flops += 2 * Bp * d_in * d_out
        if idx < len(padded) - 1:               # tanh layers
            transcendentals += Bp * d_out
        bytes_accessed += d_in * d_out * 2 + d_out * 4

    grid = (Bp // block_b,)
    in_spec_x = pl.BlockSpec((block_b, N), lambda i: (i, 0))
    out_spec = pl.BlockSpec((block_b, N), lambda i: (i, 0))

    z = pl.pallas_call(
        functools.partial(multidae_kernel, binary_input=binary_input),
        out_shape=jax.ShapeDtypeStruct((Bp, N), out_dtype),
        grid=grid,
        in_specs=[in_spec_x]
                 + [_resident_spec(a.shape, single_buffer_weights) for a in flat],
        out_specs=out_spec,
        compiler_params=pltpu.CompilerParams(
            dimension_semantics=("parallel",),
            vmem_limit_bytes=vmem_limit),
        cost_estimate=pl.CostEstimate(
            flops=flops,
            transcendentals=transcendentals,
            bytes_accessed=bytes_accessed),
    )(x, *flat)

    if Bp != B:
        z = z[:B]
    return z, rating_matrix


def _xavier_normal(key, d_in, d_out):
    # torch.nn.init.xavier_normal_: std = gain * sqrt(2 / (fan_in + fan_out))
    std = (2.0 / (d_in + d_out)) ** 0.5
    return jax.random.normal(key, (d_in, d_out), jnp.float32) * std


def _reference(x, params):
    """Pure-JAX f32 reference of the module's forward (eval mode)."""
    norm = jnp.sqrt(jnp.sum(x * x, axis=-1, keepdims=True))
    h = x / jnp.maximum(norm, 1e-12)
    (w1, b1), (w2, b2), (w3, b3), (w4, b4) = params
    h = jnp.tanh(h @ w1 + b1)
    h = jnp.tanh(h @ w2 + b2)
    h = jnp.tanh(h @ w3 + b3)
    return h @ w4 + b4


if __name__ == "__main__":
    # Small config consistent with the module:
    #   item_num = 256, mlp_hidden_size = [128], latent_dimension = 64
    #   encode dims: [256, 128, 64]   decode dims: [64, 128, 256]
    B, N_ITEMS, HID, LAT = 128, 256, 128, 64

    key = jax.random.PRNGKey(0)
    k_r, k1, k2, k3, k4 = jax.random.split(key, 5)

    # Synthetic binary user-item interaction matrix (stands in for
    # get_rating_matrix built from user histories).
    rating_matrix = (jax.random.uniform(k_r, (B, N_ITEMS)) < 0.1).astype(jnp.float32)

    params = [
        (_xavier_normal(k1, N_ITEMS, HID), jnp.zeros((1, HID), jnp.float32)),      # enc L1
        (_xavier_normal(k2, HID, LAT),     jnp.zeros((1, LAT), jnp.float32)),      # enc L2
        (_xavier_normal(k3, LAT, HID),     jnp.zeros((1, HID), jnp.float32)),      # dec L1
        (_xavier_normal(k4, HID, N_ITEMS), jnp.zeros((1, N_ITEMS), jnp.float32)),  # dec L2
    ]

    # block_b=32 here just to exercise a multi-step grid at demo sizes;
    # production default (256) is derived from the per-gen VMEM budget.
    def run(single_buffer_weights):
        z, rm = multidae_forward(rating_matrix, params, block_b=32,
                                 single_buffer_weights=single_buffer_weights)
        jax.block_until_ready((z, rm))
        return z, rm

    try:
        z, rm = run(True)
    except Exception:
        # Some jax versions reject pl.Buffered(1) for inputs; fall back to the
        # default double-buffered resident weights (correctness unchanged).
        z, rm = run(False)

    assert z.shape == (B, N_ITEMS) and rm.shape == (B, N_ITEMS)
    assert bool(jnp.all(jnp.isfinite(z)))

    # Tolerance check vs f32 reference (bf16 MXU operands => ~1e-2 rel. error budget).
    z_ref = _reference(rating_matrix, params)
    max_err = float(jnp.max(jnp.abs(z - z_ref)))
    assert max_err < 5e-2, f"max abs error {max_err} too large"

    print("KERNEL_OK")
</pallas_src>

<mosaic_0001>
module attributes {stable_mosaic.version = 11 : i64} {
  func.func @multidae_kernel(%arg0: i32, %arg1: memref<32x256xbf16, #tpu.memory_space<vmem>>, %arg2: memref<256x128xbf16, #tpu.memory_space<vmem>>, %arg3: memref<1x128xf32, #tpu.memory_space<vmem>>, %arg4: memref<128x128xbf16, #tpu.memory_space<vmem>>, %arg5: memref<1x128xf32, #tpu.memory_space<vmem>>, %arg6: memref<128x128xbf16, #tpu.memory_space<vmem>>, %arg7: memref<1x128xf32, #tpu.memory_space<vmem>>, %arg8: memref<128x256xbf16, #tpu.memory_space<vmem>>, %arg9: memref<1x256xf32, #tpu.memory_space<vmem>>, %arg10: memref<32x256xf32, #tpu.memory_space<vmem>>) attributes {dimension_semantics = [#tpu.dimension_semantics<parallel>], iteration_bounds = array<i64: 4>, scalar_prefetch = 0 : i64, scratch_operands = 0 : i64, tpu.core_type = #tpu.core_type<tc>, window_params = [{transform_indices = @transform_0, window_bounds = array<i64: 32, 256>}, {pipeline_mode = #tpu.pipeline_mode<synchronous>, transform_indices = @transform_1, window_bounds = array<i64: 256, 128>}, {pipeline_mode = #tpu.pipeline_mode<synchronous>, transform_indices = @transform_2, window_bounds = array<i64: 1, 128>}, {pipeline_mode = #tpu.pipeline_mode<synchronous>, transform_indices = @transform_3, window_bounds = array<i64: 128, 128>}, {pipeline_mode = #tpu.pipeline_mode<synchronous>, transform_indices = @transform_4, window_bounds = array<i64: 1, 128>}, {pipeline_mode = #tpu.pipeline_mode<synchronous>, transform_indices = @transform_5, window_bounds = array<i64: 128, 128>}, {pipeline_mode = #tpu.pipeline_mode<synchronous>, transform_indices = @transform_6, window_bounds = array<i64: 1, 128>}, {pipeline_mode = #tpu.pipeline_mode<synchronous>, transform_indices = @transform_7, window_bounds = array<i64: 128, 256>}, {pipeline_mode = #tpu.pipeline_mode<synchronous>, transform_indices = @transform_8, window_bounds = array<i64: 1, 256>}, {transform_indices = @transform_9, window_bounds = array<i64: 32, 256>}]} {
    %c0 = arith.constant 0 : index
    %c0_0 = arith.constant 0 : index
    %0 = vector.load %arg1[%c0, %c0_0] : memref<32x256xbf16, #tpu.memory_space<vmem>>, vector<32x256xbf16>
    %1 = arith.extf %0 : vector<32x256xbf16> to vector<32x256xf32>
    %cst = arith.constant dense<0.000000e+00> : vector<32xf32>
    %2 = vector.multi_reduction <add>, %1, %cst [1] : vector<32x256xf32> to vector<32xf32>
    %3 = vector.shape_cast %2 : vector<32xf32> to vector<32x1xf32>
    %cst_1 = arith.constant 1.000000e-24 : f32
    %4 = vector.broadcast %cst_1 : f32 to vector<32x1xf32>
    %5 = arith.maximumf %3, %4 : vector<32x1xf32>
    %6 = math.rsqrt %5 : vector<32x1xf32>
    %c0_2 = arith.constant 0 : index
    %c0_3 = arith.constant 0 : index
    %7 = vector.load %arg2[%c0_2, %c0_3] : memref<256x128xbf16, #tpu.memory_space<vmem>>, vector<256x128xbf16>
    %cst_4 = arith.constant dense<0.000000e+00> : vector<32x128xf32>
    %8 = tpu.matmul %0, %7, %cst_4 {dimension_numbers = #tpu.dot_dimension_numbers<[1], [0], [0], [1], [0, 0, 1, 1], [], []>} : vector<32x256xbf16>, vector<256x128xbf16>, vector<32x128xf32> -> vector<32x128xf32>
    %9 = vector.broadcast %6 : vector<32x1xf32> to vector<32x128xf32>
    %10 = arith.mulf %8, %9 : vector<32x128xf32>
    %c0_5 = arith.constant 0 : index
    %c0_6 = arith.constant 0 : index
    %11 = vector.load %arg3[%c0_5, %c0_6] : memref<1x128xf32, #tpu.memory_space<vmem>>, vector<1x128xf32>
    %12 = vector.broadcast %11 : vector<1x128xf32> to vector<32x128xf32>
    %13 = arith.addf %10, %12 : vector<32x128xf32>
    %14 = math.tanh %13 : vector<32x128xf32>
    %15 = arith.truncf %14 : vector<32x128xf32> to vector<32x128xbf16>
    %c0_7 = arith.constant 0 : index
    %c0_8 = arith.constant 0 : index
    %16 = vector.load %arg4[%c0_7, %c0_8] : memref<128x128xbf16, #tpu.memory_space<vmem>>, vector<128x128xbf16>
    %cst_9 = arith.constant dense<0.000000e+00> : vector<32x128xf32>
    %17 = tpu.matmul %15, %16, %cst_9 {dimension_numbers = #tpu.dot_dimension_numbers<[1], [0], [0], [1], [0, 0, 1, 1], [], []>} : vector<32x128xbf16>, vector<128x128xbf16>, vector<32x128xf32> -> vector<32x128xf32>
    %c0_10 = arith.constant 0 : index
    %c0_11 = arith.constant 0 : index
    %18 = vector.load %arg5[%c0_10, %c0_11] : memref<1x128xf32, #tpu.memory_space<vmem>>, vector<1x128xf32>
    %19 = vector.broadcast %18 : vector<1x128xf32> to vector<32x128xf32>
    %20 = arith.addf %17, %19 : vector<32x128xf32>
    %21 = math.tanh %20 : vector<32x128xf32>
    %22 = arith.truncf %21 : vector<32x128xf32> to vector<32x128xbf16>
    %c0_12 = arith.constant 0 : index
    %c0_13 = arith.constant 0 : index
    %23 = vector.load %arg6[%c0_12, %c0_13] : memref<128x128xbf16, #tpu.memory_space<vmem>>, vector<128x128xbf16>
    %cst_14 = arith.constant dense<0.000000e+00> : vector<32x128xf32>
    %24 = tpu.matmul %22, %23, %cst_14 {dimension_numbers = #tpu.dot_dimension_numbers<[1], [0], [0], [1], [0, 0, 1, 1], [], []>} : vector<32x128xbf16>, vector<128x128xbf16>, vector<32x128xf32> -> vector<32x128xf32>
    %c0_15 = arith.constant 0 : index
    %c0_16 = arith.constant 0 : index
    %25 = vector.load %arg7[%c0_15, %c0_16] : memref<1x128xf32, #tpu.memory_space<vmem>>, vector<1x128xf32>
    %26 = vector.broadcast %25 : vector<1x128xf32> to vector<32x128xf32>
    %27 = arith.addf %24, %26 : vector<32x128xf32>
    %28 = math.tanh %27 : vector<32x128xf32>
    %29 = arith.truncf %28 : vector<32x128xf32> to vector<32x128xbf16>
    %c0_17 = arith.constant 0 : index
    %c0_18 = arith.constant 0 : index
    %30 = vector.load %arg8[%c0_17, %c0_18] : memref<128x256xbf16, #tpu.memory_space<vmem>>, vector<128x256xbf16>
    %cst_19 = arith.constant dense<0.000000e+00> : vector<32x256xf32>
    %31 = tpu.matmul %29, %30, %cst_19 {dimension_numbers = #tpu.dot_dimension_numbers<[1], [0], [0], [1], [0, 0, 1, 1], [], []>} : vector<32x128xbf16>, vector<128x256xbf16>, vector<32x256xf32> -> vector<32x256xf32>
    %c0_20 = arith.constant 0 : index
    %c0_21 = arith.constant 0 : index
    %32 = vector.load %arg9[%c0_20, %c0_21] : memref<1x256xf32, #tpu.memory_space<vmem>>, vector<1x256xf32>
    %33 = vector.broadcast %32 : vector<1x256xf32> to vector<32x256xf32>
    %34 = arith.addf %31, %33 : vector<32x256xf32>
    %c0_22 = arith.constant 0 : index
    %c0_23 = arith.constant 0 : index
    %35 = vector.load %arg10[%c0_22, %c0_23] : memref<32x256xf32, #tpu.memory_space<vmem>>, vector<32x256xf32>
    tpu.vector_store %arg10[%c0_22, %c0_23], %34 {strides = array<i32>} : memref<32x256xf32, #tpu.memory_space<vmem>>, vector<32x256xf32>,
    return
  }
  func.func @transform_0(%arg0: i32) -> (i32, i32) {
    %c0_i32 = arith.constant 0 : i32
    %c0_i32_0 = arith.constant 0 : i32
    return %arg0, %c0_i32 : i32, i32
  }
  func.func @transform_1(%arg0: i32) -> (i32, i32) {
    %c0_i32 = arith.constant 0 : i32
    %c0_i32_0 = arith.constant 0 : i32
    %c0_i32_1 = arith.constant 0 : i32
    return %c0_i32, %c0_i32_0 : i32, i32
  }
  func.func @transform_2(%arg0: i32) -> (i32, i32) {
    %c0_i32 = arith.constant 0 : i32
    %c0_i32_0 = arith.constant 0 : i32
    %c0_i32_1 = arith.constant 0 : i32
    return %c0_i32, %c0_i32_0 : i32, i32
  }
  func.func @transform_3(%arg0: i32) -> (i32, i32) {
    %c0_i32 = arith.constant 0 : i32
    %c0_i32_0 = arith.constant 0 : i32
    %c0_i32_1 = arith.constant 0 : i32
    return %c0_i32, %c0_i32_0 : i32, i32
  }
  func.func @transform_4(%arg0: i32) -> (i32, i32) {
    %c0_i32 = arith.constant 0 : i32
    %c0_i32_0 = arith.constant 0 : i32
    %c0_i32_1 = arith.constant 0 : i32
    return %c0_i32, %c0_i32_0 : i32, i32
  }
  func.func @transform_5(%arg0: i32) -> (i32, i32) {
    %c0_i32 = arith.constant 0 : i32
    %c0_i32_0 = arith.constant 0 : i32
    %c0_i32_1 = arith.constant 0 : i32
    return %c0_i32, %c0_i32_0 : i32, i32
  }
  func.func @transform_6(%arg0: i32) -> (i32, i32) {
    %c0_i32 = arith.constant 0 : i32
    %c0_i32_0 = arith.constant 0 : i32
    %c0_i32_1 = arith.constant 0 : i32
    return %c0_i32, %c0_i32_0 : i32, i32
  }
  func.func @transform_7(%arg0: i32) -> (i32, i32) {
    %c0_i32 = arith.constant 0 : i32
    %c0_i32_0 = arith.constant 0 : i32
    %c0_i32_1 = arith.constant 0 : i32
    return %c0_i32, %c0_i32_0 : i32, i32
  }
  func.func @transform_8(%arg0: i32) -> (i32, i32) {
    %c0_i32 = arith.constant 0 : i32
    %c0_i32_0 = arith.constant 0 : i32
    %c0_i32_1 = arith.constant 0 : i32
    return %c0_i32, %c0_i32_0 : i32, i32
  }
  func.func @transform_9(%arg0: i32) -> (i32, i32) {
    %c0_i32 = arith.constant 0 : i32
    %c0_i32_0 = arith.constant 0 : i32
    return %arg0, %c0_i32 : i32, i32
  }
}

module attributes {stable_mosaic.version = 11 : i64} {
  func.func @multidae_kernel(%arg0: i32, %arg1: memref<32x256xbf16, #tpu.memory_space<vmem>>, %arg2: memref<256x128xbf16, #tpu.memory_space<vmem>>, %arg3: memref<1x128xf32, #tpu.memory_space<vmem>>, %arg4: memref<128x128xbf16, #tpu.memory_space<vmem>>, %arg5: memref<1x128xf32, #tpu.memory_space<vmem>>, %arg6: memref<128x128xbf16, #tpu.memory_space<vmem>>, %arg7: memref<1x128xf32, #tpu.memory_space<vmem>>, %arg8: memref<128x256xbf16, #tpu.memory_space<vmem>>, %arg9: memref<1x256xf32, #tpu.memory_space<vmem>>, %arg10: memref<32x256xf32, #tpu.memory_space<vmem>>) attributes {dimension_semantics = [#tpu.dimension_semantics<parallel>], iteration_bounds = array<i64: 4>, scalar_prefetch = 0 : i64, scratch_operands = 0 : i64, tpu.core_type = #tpu.core_type<tc>, window_params = [{transform_indices = @transform_0, window_bounds = array<i64: 32, 256>}, {pipeline_mode = #tpu.pipeline_mode<synchronous>, transform_indices = @transform_1, window_bounds = array<i64: 256, 128>}, {pipeline_mode = #tpu.pipeline_mode<synchronous>, transform_indices = @transform_2, window_bounds = array<i64: 1, 128>}, {pipeline_mode = #tpu.pipeline_mode<synchronous>, transform_indices = @transform_3, window_bounds = array<i64: 128, 128>}, {pipeline_mode = #tpu.pipeline_mode<synchronous>, transform_indices = @transform_4, window_bounds = array<i64: 1, 128>}, {pipeline_mode = #tpu.pipeline_mode<synchronous>, transform_indices = @transform_5, window_bounds = array<i64: 128, 128>}, {pipeline_mode = #tpu.pipeline_mode<synchronous>, transform_indices = @transform_6, window_bounds = array<i64: 1, 128>}, {pipeline_mode = #tpu.pipeline_mode<synchronous>, transform_indices = @transform_7, window_bounds = array<i64: 128, 256>}, {pipeline_mode = #tpu.pipeline_mode<synchronous>, transform_indices = @transform_8, window_bounds = array<i64: 1, 256>}, {transform_indices = @transform_9, window_bounds = array<i64: 32, 256>}]} {
    %c0 = arith.constant 0 : index
    %c0_0 = arith.constant 0 : index
    %0 = vector.load %arg1[%c0, %c0_0] : memref<32x256xbf16, #tpu.memory_space<vmem>>, vector<32x256xbf16>
    %1 = arith.extf %0 : vector<32x256xbf16> to vector<32x256xf32>
    %cst = arith.constant dense<0.000000e+00> : vector<32xf32>
    %2 = vector.multi_reduction <add>, %1, %cst [1] : vector<32x256xf32> to vector<32xf32>
    %3 = vector.shape_cast %2 : vector<32xf32> to vector<32x1xf32>
    %cst_1 = arith.constant 1.000000e-24 : f32
    %4 = vector.broadcast %cst_1 : f32 to vector<32x1xf32>
    %5 = arith.maximumf %3, %4 : vector<32x1xf32>
    %6 = math.rsqrt %5 : vector<32x1xf32>
    %c0_2 = arith.constant 0 : index
    %c0_3 = arith.constant 0 : index
    %7 = vector.load %arg2[%c0_2, %c0_3] : memref<256x128xbf16, #tpu.memory_space<vmem>>, vector<256x128xbf16>
    %cst_4 = arith.constant dense<0.000000e+00> : vector<32x128xf32>
    %8 = tpu.matmul %0, %7, %cst_4 {dimension_numbers = #tpu.dot_dimension_numbers<[1], [0], [0], [1], [0, 0, 1, 1], [], []>} : vector<32x256xbf16>, vector<256x128xbf16>, vector<32x128xf32> -> vector<32x128xf32>
    %9 = vector.broadcast %6 : vector<32x1xf32> to vector<32x128xf32>
    %10 = arith.mulf %8, %9 : vector<32x128xf32>
    %c0_5 = arith.constant 0 : index
    %c0_6 = arith.constant 0 : index
    %11 = vector.load %arg3[%c0_5, %c0_6] : memref<1x128xf32, #tpu.memory_space<vmem>>, vector<1x128xf32>
    %12 = vector.broadcast %11 : vector<1x128xf32> to vector<32x128xf32>
    %13 = arith.addf %10, %12 : vector<32x128xf32>
    %14 = math.tanh %13 : vector<32x128xf32>
    %15 = arith.truncf %14 : vector<32x128xf32> to vector<32x128xbf16>
    %c0_7 = arith.constant 0 : index
    %c0_8 = arith.constant 0 : index
    %16 = vector.load %arg4[%c0_7, %c0_8] : memref<128x128xbf16, #tpu.memory_space<vmem>>, vector<128x128xbf16>
    %cst_9 = arith.constant dense<0.000000e+00> : vector<32x128xf32>
    %17 = tpu.matmul %15, %16, %cst_9 {dimension_numbers = #tpu.dot_dimension_numbers<[1], [0], [0], [1], [0, 0, 1, 1], [], []>} : vector<32x128xbf16>, vector<128x128xbf16>, vector<32x128xf32> -> vector<32x128xf32>
    %c0_10 = arith.constant 0 : index
    %c0_11 = arith.constant 0 : index
    %18 = vector.load %arg5[%c0_10, %c0_11] : memref<1x128xf32, #tpu.memory_space<vmem>>, vector<1x128xf32>
    %19 = vector.broadcast %18 : vector<1x128xf32> to vector<32x128xf32>
    %20 = arith.addf %17, %19 : vector<32x128xf32>
    %21 = math.tanh %20 : vector<32x128xf32>
    %22 = arith.truncf %21 : vector<32x128xf32> to vector<32x128xbf16>
    %c0_12 = arith.constant 0 : index
    %c0_13 = arith.constant 0 : index
    %23 = vector.load %arg6[%c0_12, %c0_13] : memref<128x128xbf16, #tpu.memory_space<vmem>>, vector<128x128xbf16>
    %cst_14 = arith.constant dense<0.000000e+00> : vector<32x128xf32>
    %24 = tpu.matmul %22, %23, %cst_14 {dimension_numbers = #tpu.dot_dimension_numbers<[1], [0], [0], [1], [0, 0, 1, 1], [], []>} : vector<32x128xbf16>, vector<128x128xbf16>, vector<32x128xf32> -> vector<32x128xf32>
    %c0_15 = arith.constant 0 : index
    %c0_16 = arith.constant 0 : index
    %25 = vector.load %arg7[%c0_15, %c0_16] : memref<1x128xf32, #tpu.memory_space<vmem>>, vector<1x128xf32>
    %26 = vector.broadcast %25 : vector<1x128xf32> to vector<32x128xf32>
    %27 = arith.addf %24, %26 : vector<32x128xf32>
    %28 = math.tanh %27 : vector<32x128xf32>
    %29 = arith.truncf %28 : vector<32x128xf32> to vector<32x128xbf16>
    %c0_17 = arith.constant 0 : index
    %c0_18 = arith.constant 0 : index
    %30 = vector.load %arg8[%c0_17, %c0_18] : memref<128x256xbf16, #tpu.memory_space<vmem>>, vector<128x256xbf16>
    %cst_19 = arith.constant dense<0.000000e+00> : vector<32x256xf32>
    %31 = tpu.matmul %29, %30, %cst_19 {dimension_numbers = #tpu.dot_dimension_numbers<[1], [0], [0], [1], [0, 0, 1, 1], [], []>} : vector<32x128xbf16>, vector<128x256xbf16>, vector<32x256xf32> -> vector<32x256xf32>
    %c0_20 = arith.constant 0 : index
    %c0_21 = arith.constant 0 : index
    %32 = vector.load %arg9[%c0_20, %c0_21] : memref<1x256xf32, #tpu.memory_space<vmem>>, vector<1x256xf32>
    %33 = vector.broadcast %32 : vector<1x256xf32> to vector<32x256xf32>
    %34 = arith.addf %31, %33 : vector<32x256xf32>
    %c0_22 = arith.constant 0 : index
    %c0_23 = arith.constant 0 : index
    %35 = vector.load %arg10[%c0_22, %c0_23] : memref<32x256xf32, #tpu.memory_space<vmem>>, vector<32x256xf32>
    tpu.vector_store %arg10[%c0_22, %c0_23], %34 {strides = array<i32>} : memref<32x256xf32, #tpu.memory_space<vmem>>, vector<32x256xf32>,
    return
  }
  func.func @transform_0(%arg0: i32) -> (i32, i32) {
    %c0_i32 = arith.constant 0 : i32
    %c0_i32_0 = arith.constant 0 : i32
    return %arg0, %c0_i32 : i32, i32
  }
  func.func @transform_1(%arg0: i32) -> (i32, i32) {
    %c0_i32 = arith.constant 0 : i32
    %c0_i32_0 = arith.constant 0 : i32
    %c0_i32_1 = arith.constant 0 : i32
    return %c0_i32, %c0_i32_0 : i32, i32
  }
  func.func @transform_2(%arg0: i32) -> (i32, i32) {
    %c0_i32 = arith.constant 0 : i32
    %c0_i32_0 = arith.constant 0 : i32
    %c0_i32_1 = arith.constant 0 : i32
    return %c0_i32, %c0_i32_0 : i32, i32
  }
  func.func @transform_3(%arg0: i32) -> (i32, i32) {
    %c0_i32 = arith.constant 0 : i32
    %c0_i32_0 = arith.constant 0 : i32
    %c0_i32_1 = arith.constant 0 : i32
    return %c0_i32, %c0_i32_0 : i32, i32
  }
  func.func @transform_4(%arg0: i32) -> (i32, i32) {
    %c0_i32 = arith.constant 0 : i32
    %c0_i32_0 = arith.constant 0 : i32
    %c0_i32_1 = arith.constant 0 : i32
    return %c0_i32, %c0_i32_0 : i32, i32
  }
  func.func @transform_5(%arg0: i32) -> (i32, i32) {
    %c0_i32 = arith.constant 0 : i32
    %c0_i32_0 = arith.constant 0 : i32
    %c0_i32_1 = arith.constant 0 : i32
    return %c0_i32, %c0_i32_0 : i32, i32
  }
  func.func @transform_6(%arg0: i32) -> (i32, i32) {
    %c0_i32 = arith.constant 0 : i32
    %c0_i32_0 = arith.constant 0 : i32
    %c0_i32_1 = arith.constant 0 : i32
    return %c0_i32, %c0_i32_0 : i32, i32
  }
  func.func @transform_7(%arg0: i32) -> (i32, i32) {
    %c0_i32 = arith.constant 0 : i32
    %c0_i32_0 = arith.constant 0 : i32
    %c0_i32_1 = arith.constant 0 : i32
    return %c0_i32, %c0_i32_0 : i32, i32
  }
  func.func @transform_8(%arg0: i32) -> (i32, i32) {
    %c0_i32 = arith.constant 0 : i32
    %c0_i32_0 = arith.constant 0 : i32
    %c0_i32_1 = arith.constant 0 : i32
    return %c0_i32, %c0_i32_0 : i32, i32
  }
  func.func @transform_9(%arg0: i32) -> (i32, i32) {
    %c0_i32 = arith.constant 0 : i32
    %c0_i32_0 = arith.constant 0 : i32
    return %arg0, %c0_i32 : i32, i32
  }
}

</mosaic_0001>

<bundles_post_ra>
// kernel: tpu_custom_call.1
= control target key start
LH: loop header
LB: loop body
LE: loop exit
PB: predicated region body
PF: predicated region fallthrough
CT: control target
= control target key end

     0   :  { %s2067_s0 = inlined_call_operand.hbm [shape: bf16[128,256], index: 0, kind: input, shape index: {}]   ;;  %s2068_s1 = inlined_call_operand.hbm [shape: bf16[256,128], index: 1, kind: input, shape index: {}]   ;;  %s2069_s2 = inlined_call_operand.vmem [shape: f32[1,128], index: 2, kind: input, shape index: {}]   ;;  %s2070_s3 = inlined_call_operand.hbm [shape: bf16[128,128], index: 3, kind: input, shape index: {}]   ;;  %s2071_s4 = inlined_call_operand.vmem [shape: f32[1,128], index: 4, kind: input, shape index: {}]   ;;  %s2072_s5 = inlined_call_operand.hbm [shape: bf16[128,128], index: 5, kind: input, shape index: {}]   ;;  %s2073_s6 = inlined_call_operand.vmem [shape: f32[1,128], index: 6, kind: input, shape index: {}]   ;;  %s2074_s7 = inlined_call_operand.hbm [shape: bf16[128,256], index: 7, kind: input, shape index: {}]   ;;  %s2075_s8 = inlined_call_operand.vmem [shape: f32[1,256], index: 8, kind: input, shape index: {}]   ;;  %s2076_s9 = inlined_call_operand.hbm [shape: f32[128,256], index: 9, kind: output, shape index: {}]  }
   0x1   :  { %2083 = sst [smem:[#allocation16_spill]] %s2068_s1 }
   0x2   :  { %2084 = sst [smem:[#allocation17_spill]] %s2070_s3 }
   0x3   :  { %2085 = sst [smem:[#allocation18_spill]] %s2072_s5 }
   0x4   :  { %14 = vsyncpa [#allocation3], 0 }
   0x5   :  { %16 = vsyncpa [#allocation3 + $0x1], 0 }
   0x6   :  { %17 = vsyncpa [#allocation6], 0 }
   0x7   :  { %18 = vsyncpa [#allocation9], 0 }
   0x8   :  { %19 = vsyncpa [#allocation4], 0 }
   0x9   :  { %21 = vsyncpa [#allocation4 + $0x1], 0  ;;  %s1836_s30 = smov 0   ;;  %s1838_s10 = smov 0  }
   0xa   :  { %s1840_s11 = smov 0   ;;  %s1842_s12 = smov 0  }
   0xb LB: > { %s1857_s13 = sadd.s32 4294967295, %s1771_s12   ;;  %s1210_s14 = sadd.s32 4294967294, %s1771_s12   ;;  %s1771_s12 = sphi %s1842_s12, %s2109_s12   ;;  %s1767_s11 = sphi %s1840_s11, %s2108_s11   ;;  %s1763_s10 = sphi %s1838_s10, %s2107_s10   ;;  %s1759_s30 = sphi %s1836_s30, %s2106_s30  }
   0xc   : > { %p47_p0 = scmp.ne.s32.totalorder %s1763_s10, %s1759_s30  ;;  %p2077_p1 = scmp.eq.s32.totalorder %s1857_s13, 0 }
   0xd   : > { %p245_p3 = scmp.eq.s32.totalorder %s1210_s14, 3  ;;  %p1211_p5 = scmp.ge.s32.totalorder %s1771_s12, 1 }
   0xe   : > { %p1866_p4 = por %p2077_p1, %p47_p0  ;;  %p252_p7 = scmp.lt.s32.totalorder %s1771_s12, 5 }
   0xf   : > { %p1871_p6 = por %p245_p3, %p47_p0  ;;  %s1773_s18 = smov [#allocation5]  }
  0x10   : > { %s2086_s15 = scalar_select %p1866_p4, 1, 0 }
  0x11   : > { %s2087_s16 = scalar_select %p1871_p6, 1, 0 }
  0x12   : > { %p1876_p8 = pnand %p1211_p5, %p252_p7  ;;  %s264_s19 = sshll.u32 %s1773_s18, 4  ;;  %s265_s19 = int_to_ptr.vmem [resolvable:$true] %s264_s19 }
  0x13   : > { %s1774_s21 = smov [#allocation8]   ;;  %s1775_s23 = smov [#allocation7]  }
  0x14   : > { %s2088_s17 = scalar_select %p1876_p8, 1, 0 }
  0x15   : > { %p1401_p9 = pneg %p1876_p8  ;;  %s296_s22 = sshll.u32 %s1774_s21, 4  ;;  %s297_s22 = int_to_ptr.vmem [resolvable:$true] %s296_s22 }
  0x16   : > { %s280_s24 = sshll.u32 %s1775_s23, 4  ;;  %s1578_s25 = scalar_lea.vmem %s265_s19, 2048  ;;  %s281_s24 = int_to_ptr.vmem [resolvable:$true] %s280_s24 }
  0x17   : > { %p1884_p10 = pnand %p1401_p9, %p2077_p1  ;;  %p1579_p12 = scmp.ne.s32.totalorder %s265_s19, %s1578_s25 }
  0x18   : > { %p1586_p3 = scmp.lt.s32.totalorder %s265_s19, %s265_s19  ;;  %p1587_p5 = scmp.lt.s32.totalorder %s1578_s25, %s1578_s25 }
  0x19   : > { %p1569_p11 = pneg %p1884_p10 }
  0x1a   : > { %p1588_p7 = por %p1587_p5, %p1586_p3 }
  0x1b   : > { %p1581_p13 = pnand %p1579_p12, %p1569_p11 }
  0x1d   : > { %p1582_p0 = pneg %p1581_p13 }
  0x1f   : > { %p1589_p9 = pnand %p1588_p7, %p1582_p0 }
  0x21   : > { %1592 = shalt.err (!%p1589_p9)
}
  0x22   : > { %s1776_s26 = smov 64   ;;  %s1777_s27 = smov 4  }
  0x23   : > { %s2090_s1 = sld [smem:[#allocation16_spill]]  ;;  %s1604_s14 = scalar_lea.vmem %s297_s22, 1024 }
  0x24   : > { %p1605_p1 = scmp.ne.s32.totalorder %s297_s22, %s1604_s14  ;;  %p1612_p2 = scmp.lt.s32.totalorder %s297_s22, %s297_s22 }
  0x25   : > { %p1613_p6 = scmp.lt.s32.totalorder %s1604_s14, %s1604_s14 }
  0x26   : > { %p1607_p12 = pnand %p1605_p1, %p1569_p11 }
  0x27   : > { %p1614_p3 = por %p1613_p6, %p1612_p2 }
  0x28   : > { %p1608_p13 = pneg %p1607_p12 }
  0x29   : > { %1404 = dma.hbm_to_vmem [thread:$0]  (!%p1884_p10), %s2090_s1, 2048, %s265_s19, [#allocation6], %s1776_s26, %s1776_s26, %s1777_s27  }
  0x2a   : > { %p1615_p0 = pnand %p1614_p3, %p1608_p13 }
  0x2c   : > { %1618 = shalt.err (!%p1615_p0)
}
  0x2d   : > { %s2091_s5 = sld [smem:[#allocation18_spill]]  ;;  %s1630_s19 = scalar_lea.vmem %s281_s24, 1024 }
  0x2e   : > { %p1631_p5 = scmp.ne.s32.totalorder %s281_s24, %s1630_s19  ;;  %p1638_p9 = scmp.lt.s32.totalorder %s281_s24, %s281_s24 }
  0x2f   : > { %p1639_p12 = scmp.lt.s32.totalorder %s1630_s19, %s1630_s19 }
  0x30   : > { %p1633_p7 = pnand %p1631_p5, %p1569_p11 }
  0x31   : > { %p1640_p4 = por %p1639_p12, %p1638_p9 }
  0x32   : > { %p1634_p1 = pneg %p1633_p7 }
  0x33   : > { %1410 = dma.hbm_to_vmem [thread:$0]  (!%p1884_p10), %s2091_s5, 1024, %s297_s22, [#allocation9], %s1776_s26, %s1776_s26, %s1777_s27  }
  0x34   : > { %p1641_p2 = pnand %p1640_p4, %p1634_p1 }
  0x36   : > { %1644 = shalt.err (!%p1641_p2)
}
  0x37   : > { %s2092_s3 = sld [smem:[#allocation17_spill]]  ;;  %s1778_s22 = smov [#allocation10]  }
  0x38   : > { %s312_s28 = sshll.u32 %s1778_s22, 4  ;;  %s313_s28 = int_to_ptr.vmem [resolvable:$true] %s312_s28 }
  0x39   : > { %s1656_s29 = scalar_lea.vmem %s313_s28, 2048  ;;  %p1664_p0 = scmp.lt.s32.totalorder %s313_s28, %s313_s28 }
  0x3a   : > { %p1657_p6 = scmp.ne.s32.totalorder %s313_s28, %s1656_s29  ;;  %p1665_p5 = scmp.lt.s32.totalorder %s1656_s29, %s1656_s29 }
  0x3c   : > { %p1659_p13 = pnand %p1657_p6, %p1569_p11  ;;  %p1666_p4 = por %p1665_p5, %p1664_p0 }
  0x3d   : > { %1407 = dma.hbm_to_vmem [thread:$0]  (!%p1884_p10), %s2092_s3, 1024, %s281_s24, [#allocation6], %s1776_s26, %s1776_s26, %s1777_s27  }
  0x3e   : > { %p1660_p3 = pneg %p1659_p13 }
  0x40   : > { %p1667_p7 = pnand %p1666_p4, %p1660_p3 }
  0x42   : > { %1670 = shalt.err (!%p1667_p7)
}
  0x43   : > { %s2079_s14 = smov 128   ;;  %s2080_s24 = smov 8  }
  0x44   : > { %1413 = dma.hbm_to_vmem [thread:$0]  (!%p1884_p10), %s2074_s7, 2048, %s313_s28, [#allocation9], %s2079_s14, %s2079_s14, %s2080_s24  }
  0x45   : > { %s1926_s18 = sadd.s32 1, %s1771_s12   ;;  %s34_s19 = sadd.s32 1, %s1767_s11 }
  0x46   : > { %s31_s21 = ssub.s32 %s1771_s12, %s1926_s18  ;;  %p41_p1 = scmp.ne.s32.totalorder %s1767_s11, %s1763_s10 }
  0x47   : > { %p32_p11 = scmp.eq.s32.totalorder %s31_s21, 0  ;;  %p42_p9 = scmp.eq.s32.totalorder %s1771_s12, 0 }
  0x48   : > { %p2093_p2 = scmp.eq.s32.totalorder %s1857_s13, 3  ;;  %p1426_p13 = scmp.lt.s32.totalorder %s1771_s12, 4 }
  0x49   : > { %s1935_s23 = scalar_select %p32_p11, %s1767_s11, %s34_s19  }
  0x4a   : > { %p43_p12 = por %p42_p9, %p41_p1  ;;  %p1939_p6 = por %p2093_p2, %p41_p1 }
  0x4b   : > { %s329_s25 = sand.u32 1, %s1767_s11   ;;  %s1290_s28 = sshll.u32 %s1771_s12, 9 }
  0x4c   : > { %s2094_s20 = scalar_select %p1939_p6, 1, 0 }
  0x4d   : > { %s1217_s22 = sshll.u32 %s329_s25, 5  ;;  %s1949_s27 = scalar_lea.hbm %s2067_s0, %s1290_s28 }
  0x4e   : > { %s333_s21 = scalar_lea.vmem [#allocation2], %s1217_s22  ;;  %p1953_p10 = pnand %p1426_p13, %p43_p12 }
  0x4f   : > { %s341_s19 = sshll.u32 %s333_s21, 4  ;;  %s1957_s24 = scalar_lea.sflag [#allocation3], %s329_s25  ;;  %s1951_s19 = int_to_ptr.vmem [resolvable:$true] %s341_s19 }
  0x50   : > { %s1671_s1 = scalar_lea.hbm %s1949_s27, 512  ;;  %p1673_p0 = pneg %p1953_p10 }
  0x51   : > { %p1672_p3 = scmp.ne.s32.totalorder %s1949_s27, %s1671_s1  ;;  %s1676_s22 = scalar_lea.hbm %s2067_s0, 2048 }
  0x52   : > { %p1677_p7 = scmp.lt.s32.totalorder %s1949_s27, %s2067_s0  ;;  %p1678_p11 = scmp.lt.s32.totalorder %s1676_s22, %s1671_s1 }
  0x53   : > { %p1674_p5 = pnand %p1673_p0, %p1672_p3 }
  0x54   : > { %p1679_p1 = por %p1678_p11, %p1677_p7 }
  0x55   : > { %p1675_p4 = pneg %p1674_p5 }
  0x57   : > { %p1680_p9 = pnand %p1679_p1, %p1675_p4 }
  0x59   : > { %1683 = shalt.err (!%p1680_p9)
}
  0x5a   : > { %s1684_s25 = scalar_lea.vmem %s1951_s19, 512  ;;  %s1781_s3 = smov [#allocation2]  }
  0x5b   : > { %p1685_p12 = scmp.ne.s32.totalorder %s1951_s19, %s1684_s25  ;;  %s1689_s5 = sshll.u32 %s1781_s3, 4  ;;  %s1690_s5 = int_to_ptr.vmem [resolvable:$false] %s1689_s5 }
  0x5c   : > { %s1691_s28 = scalar_lea.vmem %s1690_s5, 1024  ;;  %p1692_p3 = scmp.lt.s32.totalorder %s1951_s19, %s1690_s5 }
  0x5d   : > { %p1687_p2 = pnand %p1685_p12, %p1673_p0  ;;  %p1693_p5 = scmp.lt.s32.totalorder %s1691_s28, %s1684_s25 }
  0x5f   : > { %p1688_p13 = pneg %p1687_p2  ;;  %p1694_p6 = por %p1693_p5, %p1692_p3 }
  0x61   : > { %p1695_p8 = pnand %p1694_p6, %p1688_p13 }
  0x63   : > { %1698 = shalt.err (!%p1695_p8)
}
  0x64   : > { %s2096_s1 = smov 8   ;;  %s2097_s29 = smov 128  }
  0x65   : > { %1417 = dma.hbm_to_vmem [thread:$0]  (!%p1953_p10), %s1949_s27, 512, %s1951_s19, %s1957_s24, %s2097_s29, %s2097_s29, %s2096_s1  }
  0x66   : > { %p2098_p0 = scmp.ne.s32.totalorder %s2088_s17, 0 }
  0x67   : > { %s1984_s3 = sand.u32 (!%p2098_p0), 1, %s1763_s10   ;;  %p2099_p8 = scmp.ne.s32.totalorder (!%p2098_p0), %s2086_s15, 0 }
  0x68   : > { %353 = sbr.rel (%p2098_p0) target bundleno = 1036 (0x40c), region = 56  ;;  %s1222_s5 = sshll.u32 (!%p2098_p0), %s1984_s3, 5 }
  0x69   : > { %s356_s22 = scalar_lea.sflag (!%p2098_p0), [#allocation3], %s1984_s3  ;;  %s1988_s26 = scalar_lea.vmem (!%p2098_p0), [#allocation2], %s1222_s5 }
  0x6d   : > { %1742 = dma.done.wait (%p2099_p8), %s356_s22, 512  }
  0x6e   : > { %1744 = vsyncadd (%p2099_p8), %s356_s22, 4294966784  ;;  %p2100_p6 = scmp.eq.s32.totalorder %s1857_s13, 0 }
  0x70   : > { %1746 = dma.done.wait (%p2100_p6), [#allocation6], 3072   ;;  %p2101_p10 = pmov %p2100_p6 }
  0x71   : > { %p2102_p4 = pmov %p2100_p6 }
  0x72   : > { %1748 = vsyncadd (%p2101_p10), [#allocation6], 4294964224 }
  0x73   : > { %1750 = dma.done.wait (%p2102_p4), [#allocation9], 3072   ;;  %p2103_p7 = pmov %p2102_p4 }
  0x74   : > { %v1475_v0 = vld [vmem:[#allocation5 + $0x78] sm:$0xff]   ;;  %v1477_v2 = vld [vmem:[#allocation5 + $0x70] sm:$0xff]   ;;  %v1479_v4 = vld [vmem:[#allocation5 + $0x68] sm:$0xff]   ;;  %s1227_s28 = sshll.u32 %s1984_s3, 6  ;;  %s1292_s5 = sshll.u32 %s1857_s13, 10 }
  0x75   : > { %1752 = vsyncadd (%p2103_p7), [#allocation9], 4294964224  ;;  %v1476_v1 = vld [vmem:[#allocation5 + $0x38] sm:$0xff]   ;;  %1293 = vmatprep.subr.bf16.mxu0 %v1475_v0  ;;  %v1478_v3 = vld [vmem:[#allocation5 + $0x30] sm:$0xff]   ;;  %s409_s1 = scalar_lea.vmem [#allocation11], %s1227_s28  ;;  %s2025_s15 = scalar_lea.hbm %s2076_s9, %s1292_s5 }
  0x76   : > { %1294 = vmatpush3.bf16.msra.mxu0 %v1476_v1  ;;  %v1480_v5 = vld [vmem:[#allocation5 + $0x28] sm:$0xff]   ;;  %v1481_v6 = vld [vmem:[#allocation5 + $0x60] sm:$0xff]   ;;  %v1483_v8 = vld [vmem:[#allocation5 + $0x58] sm:$0xff]   ;;  %s1099_s29 = sshll.u32 %s409_s1, 4  ;;  %s1085_s17 = scalar_lea.sflag [#allocation4], %s1984_s3  ;;  %s2020_s29 = int_to_ptr.vmem [resolvable:$true] %s1099_s29 }
  0x77   : > { %1295 = vmatprep.subr.bf16.mxu0 %v1477_v2  ;;  %v1482_v7 = vld [vmem:[#allocation5 + $0x20] sm:$0xff]   ;;  %v1484_v9 = vld [vmem:[#allocation5 + $0x18] sm:$0xff]   ;;  %v1485_v10 = vld [vmem:[#allocation5 + $0x50] sm:$0xff]   ;;  %s1699_s14 = scalar_lea.vmem %s2020_s29, 1024  ;;  %p2104_p1 = scmp.ne.s32.totalorder %s2094_s20, 0 }
  0x78   : > { %v413_v11 = vld [vmem:[%s1988_s26] sm:$0xff]  ;;  %v414_v12 = vld [vmem:[%s1988_s26 + $0x8] sm:$0xff]  ;;  %v415_v13 = vld [vmem:[%s1988_s26 + $0x10] sm:$0xff]  ;;  %p1700_p11 = scmp.ne.s32.totalorder %s2020_s29, %s1699_s14  ;;  %s1783_s13 = smov [#allocation11]  }
  0x79   : > { %v1486_v14 = vld [vmem:[#allocation5 + $0x10] sm:$0xff]   ;;  %v1229_v15 = vcombine.high %v413_v11, %v414_v12  ;;  %v416_v16 = vld [vmem:[%s1988_s26 + $0x18] sm:$0xff]  ;;  %v417_v17 = vunpack.c.l.bf16 %v413_v11  ;;  %v418_v18 = vunpack.c.h.bf16 %v413_v11  ;;  %v1487_v19 = vld [vmem:[#allocation5 + $0x48] sm:$0xff]   ;;  %v419_v20 = vunpack.c.l.bf16 %v414_v12  ;;  %s1703_s24 = sshll.u32 %s1783_s13, 4  ;;  %s1704_s24 = int_to_ptr.vmem [resolvable:$false] %s1703_s24 }
  0x7a   : > { %1296 = vmatpush3.bf16.msra.mxu0 %v1478_v3  ;;  %v420_v21 = vunpack.c.h.bf16 %v414_v12  ;;  %v421_v23 = vunpack.c.l.bf16 %v415_v13  ;;  %v422_v24 = vunpack.c.h.bf16 %v415_v13  ;;  %v423_v25 = vunpack.c.l.bf16 %v416_v16  ;;  %v1488_v27 = vld [vmem:[#allocation5 + $0x8] sm:$0xff]   ;;  %v1489_v30 = vld [vmem:[#allocation5 + $0x40] sm:$0xff]   ;;  %v1495_v36 = vld [vmem:[#allocation7 + $0x38] sm:$0xff]   ;;  %p1701_p9 = pnand %p1700_p11, %p2104_p1  ;;  %s1705_s27 = scalar_lea.vmem %s1704_s24, 2048 }
  0x7b   : > { %1297 = vmatprep.subr.bf16.mxu0 %v1479_v4  ;;  %625 = vmatprep.mubr.bf16.mxu0 %v1229_v15  ;;  %v425_v22 = vadd.f32 %v418_v18, %v417_v17  ;;  %v424_v26 = vunpack.c.h.bf16 %v416_v16  ;;  %v1490_v32 = vld [vmem:[#allocation5] sm:$0xff]   ;;  %v1228_v33 = vcombine.low %v413_v11, %v414_v12  ;;  %v1231_v34 = vcombine.high %v415_v13, %v416_v16  ;;  %v1496_v37 = vld [vmem:[#allocation7 + $0x30] sm:$0xff]   ;;  %v1497_v38 = vld [vmem:[#allocation7 + $0x28] sm:$0xff]   ;;  %p1706_p2 = scmp.lt.s32.totalorder %s2020_s29, %s1704_s24  ;;  %p1707_p13 = scmp.lt.s32.totalorder %s1705_s27, %s1699_s14 }
  0x7c   : > { %v428_v28 = vadd.f32 %v420_v21, %v419_v20  ;;  %v431_v29 = vadd.f32 %v422_v24, %v421_v23  ;;  %v1230_v35 = vcombine.low %v415_v13, %v416_v16  ;;  %1341 = vmatprep.subr.bf16.mxu1 %v1495_v36  ;;  %v1498_v39 = vld [vmem:[#allocation7 + $0x20] sm:$0xff]   ;;  %v1499_v40 = vld [vmem:[#allocation7 + $0x18] sm:$0xff]   ;;  %v1500_v41 = vld [vmem:[#allocation7 + $0x10] sm:$0xff]   ;;  %p1702_p12 = pneg %p1701_p9 }
  0x7d   : > { %426 = vadd.xlane.f32.xlu0 %v425_v22  ;;  %v434_v31 = vadd.f32 %v424_v26, %v423_v25  ;;  %1342 = vmatpush3.bf16.msra.mxu1 %v1495_v36  ;;  %v1501_v42 = vld [vmem:[#allocation7 + $0x8] sm:$0xff]   ;;  %v1502_v43 = vld [vmem:[#allocation7] sm:$0xff]   ;;  %v1503_v44 = vld [vmem:[#allocation8 + $0x38] sm:$0xff]   ;;  %p1708_p3 = por %p1707_p13, %p1706_p2 }
  0x7e   : > { %1298 = vmatpush3.bf16.msra.mxu0 %v1480_v5  ;;  %432 = vadd.xlane.f32.xlu1 %v431_v29  ;;  %v1504_v45 = vld [vmem:[#allocation8 + $0x30] sm:$0xff]   ;;  %v1248_v60 = vld [vmem:[%s2069_s2] ss:$0 sm:$0xff]  ;;  %v1505_v21 = vld [vmem:[#allocation8 + $0x28] sm:$0xff]  }
  0x7f   : > { %1299 = vmatprep.subr.bf16.mxu0 %v1481_v6  ;;  %1343 = vmatprep.subr.bf16.mxu1 %v1496_v37  ;;  %v1506_v22 = vld [vmem:[#allocation8 + $0x20] sm:$0xff]   ;;  %v1507_v23 = vld [vmem:[#allocation8 + $0x18] sm:$0xff]   ;;  %v1508_v24 = vld [vmem:[#allocation8 + $0x10] sm:$0xff]   ;;  %p1709_p5 = pnand %p1708_p3, %p1702_p12 }
  0x80   : > { %v1509_v25 = vld [vmem:[#allocation8 + $0x8] sm:$0xff]   ;;  %v1510_v26 = vld [vmem:[#allocation8] sm:$0xff]  }
  0x81   : > { %429 = vadd.xlane.f32.xlu0 %v428_v28  ;;  %1344 = vmatpush3.bf16.msra.mxu1 %v1496_v37  ;;  %v1513_v28 = vld [vmem:[#allocation10 + $0x74] ss:$8 sps:$4 sm:$0xff]   ;;  %v1516_v29 = vld [vmem:[#allocation10 + $0x64] ss:$8 sps:$4 sm:$0xff]  }
  0x82   : > { %1300 = vmatpush3.bf16.msra.mxu0 %v1482_v7  ;;  %435 = vadd.xlane.f32.xlu1 %v434_v31 }
  0x83   : > { %1301 = vmatprep.subr.bf16.mxu0 %v1483_v8  ;;  %1345 = vmatprep.subr.bf16.mxu1 %v1497_v38 }
  0x85   : > { %1346 = vmatpush3.bf16.msra.mxu1 %v1497_v38 }
  0x86   : > { %1302 = vmatpush3.bf16.msra.mxu0 %v1484_v9  ;;  %1347 = vmatprep.subr.bf16.mxu1 %v1498_v39 }
  0x87   : > { %1303 = vmatprep.subr.bf16.mxu0 %v1485_v10 }
  0x89   : > { %1348 = vmatpush3.bf16.msra.mxu1 %v1498_v39 }
  0x8a   : > { %1304 = vmatpush3.bf16.msra.mxu0 %v1486_v14  ;;  %1349 = vmatprep.subr.bf16.mxu1 %v1499_v40 }
  0x8b   : > { %1305 = vmatprep.subr.bf16.mxu0 %v1487_v19 }
  0x8d   : > { %1350 = vmatpush3.bf16.msra.mxu1 %v1499_v40 }
  0x8e   : > { %1306 = vmatpush3.bf16.msra.mxu0 %v1488_v27  ;;  %1351 = vmatprep.subr.bf16.mxu1 %v1500_v41  ;;  %v1511_v27 = vld [vmem:[#allocation10 + $0x70] ss:$8 sps:$4 sm:$0xff]  }
  0x8f   : > { %1307 = vmatprep.subr.bf16.mxu0 %v1489_v30  ;;  %v1514_v30 = vld [vmem:[#allocation10 + $0x60] ss:$8 sps:$4 sm:$0xff]  }
  0x91   : > { %1352 = vmatpush3.bf16.msra.mxu1 %v1500_v41 }
  0x92   : > { %1308 = vmatpush3.bf16.msra.mxu0 %v1490_v32  ;;  %1353 = vmatprep.subr.bf16.mxu1 %v1501_v42  ;;  %v1249_v32 = vld [vmem:[%s2071_s4] ss:$0 sm:$0xff] }
  0x93   : > { %1361 = vmatprep.subr.bf16.mxu0 %v1503_v44 }
  0x95   : > { %626 = vmatmul.mubr.bf16.vlgmr.msra.gmra.mxu0 %v1228_v33  ;;  %1354 = vmatpush3.bf16.msra.mxu1 %v1501_v42 }
  0x96   : > { %633 = vmatprep.mubr.bf16.mxu0 %v1231_v34  ;;  %1355 = vmatprep.subr.bf16.mxu1 %v1502_v43 }
  0x97   : > { %1362 = vmatpush3.bf16.msra.mxu0 %v1503_v44 }
  0x98   : > { %1363 = vmatprep.subr.bf16.mxu0 %v1504_v45 }
  0x99   : > { %1356 = vmatpush3.bf16.msra.mxu1 %v1502_v43 }
  0x9a   : > { %1023 = vmatprep.subr.bf16.mxu1 %v1513_v28 }
  0x9b   : > { %1364 = vmatpush3.bf16.msra.mxu0 %v1504_v45 }
  0x9c   : > { %1365 = vmatprep.subr.bf16.mxu0 %v1505_v21 }
  0x9d   : > { %634 = vmatmul.mubr.bf16.gmra.mxu0 %v1230_v35 }
  0x9f   : > { %1366 = vmatpush3.bf16.msra.mxu0 %v1505_v21 }
  0xa0   : > { %1367 = vmatprep.subr.bf16.mxu0 %v1506_v22 }
  0xa3   : > { %1368 = vmatpush3.bf16.msra.mxu0 %v1506_v22 }
  0xa4   : > { %1369 = vmatprep.subr.bf16.mxu0 %v1507_v23 }
  0xa7   : > { %1370 = vmatpush3.bf16.msra.mxu0 %v1507_v23 }
  0xa8   : > { %1371 = vmatprep.subr.bf16.mxu0 %v1508_v24 }
  0xab   : > { %1372 = vmatpush3.bf16.msra.mxu0 %v1508_v24 }
  0xac   : > { %1373 = vmatprep.subr.bf16.mxu0 %v1509_v25 }
  0xaf   : > { %1374 = vmatpush3.bf16.msra.mxu0 %v1509_v25 }
  0xb0   : > { %1375 = vmatprep.subr.bf16.mxu0 %v1510_v26 }
  0xb3   : > { %1376 = vmatpush3.bf16.msra.mxu0 %v1510_v26 }
 0x106   : > { %v427_v46 = vpop.xlane.xlu0 %426 }
 0x107   : > { %v437_v47 = vmax.f32 %v427_v46, 1e-24  ;;  %v433_v49 = vpop.xlane.xlu1 %432  ;;  %v1519_v46 = vld [vmem:[#allocation10 + $0x54] ss:$8 sps:$4 sm:$0xff]  }
 0x108   : > { %v439_v51 = vmax.f32 %v433_v49, 1e-24  ;;  %v1520_v49 = vld [vmem:[#allocation10 + $0x40] ss:$8 sps:$4 sm:$0xff]  }
 0x109   : > { %1535 = vrsqrt.f32 %v437_v47  ;;  %v1517_v47 = vld [vmem:[#allocation10 + $0x50] ss:$8 sps:$4 sm:$0xff]  }
 0x10a   : > { %v430_v48 = vpop.xlane.xlu0 %429 }
 0x10b   : > { %v438_v50 = vmax.f32 %v430_v48, 1e-24  ;;  %v436_v52 = vpop.xlane.xlu1 %435  ;;  %v1522_v48 = vld [vmem:[#allocation10 + $0x44] ss:$8 sps:$4 sm:$0xff]  }
 0x10c   : > { %v440_v53 = vmax.f32 %v436_v52, 1e-24  ;;  %v1528_v52 = vld [vmem:[#allocation10 + $0x24] ss:$8 sps:$4 sm:$0xff]  }
 0x10d   : > { %1537 = vrsqrt.f32 %v438_v50  ;;  %v1525_v50 = vld [vmem:[#allocation10 + $0x34] ss:$8 sps:$4 sm:$0xff]  }
 0x10e   : > { %1539 = vrsqrt.f32 %v439_v51  ;;  %v1523_v51 = vld [vmem:[#allocation10 + $0x30] ss:$8 sps:$4 sm:$0xff]  }
 0x10f   : > { %1541 = vrsqrt.f32 %v440_v53  ;;  %v1526_v53 = vld [vmem:[#allocation10 + $0x20] ss:$8 sps:$4 sm:$0xff]  }
 0x116   : > { %v1536_v55 = vpop.eup %1535 }
 0x11a   : > { %v1538_v61 = vpop.eup %1537 }
 0x11b   : > { %v1540_v3 = vpop.eup %1539 }
 0x11c   : > { %v1542_v9 = vpop.eup %1541 }
 0x155   : > { %v1309_v54 = vpop.f32.mrf.mxu0 }
 0x157   : > { %v1310_v56 = vpop.f32.mrf.mxu0 }
 0x158   : > { %v1311_v57 = vadd.f32 %v1310_v56, %v1309_v54  ;;  %v1531_v54 = vld [vmem:[#allocation10 + $0x14] ss:$8 sps:$4 sm:$0xff]   ;;  %v1529_v56 = vld [vmem:[#allocation10 + $0x10] ss:$8 sps:$4 sm:$0xff]  }
 0x159   : > { %v1312_v58 = vpop.f32.mrf.mxu0 }
 0x15a   : > { %v642_v59 = vmul.f32 %v1536_v55, %v1311_v57  ;;  %v1782_v55 = vmov 0   ;;  %v1534_v57 = vld [vmem:[#allocation10 + $0x4] ss:$8 sps:$4 sm:$0xff]  }
 0x15b   : > { %v1313_v62 = vpop.f32.mrf.mxu0 }
 0x15c   : > { %v1314_v63 = vadd.f32 %v1313_v62, %v1312_v58  ;;  %v653_v0 = vadd.f32 %v1248_v60, %v642_v59  ;;  %v1532_v58 = vld [vmem:[#allocation10] ss:$8 sps:$4 sm:$0xff]  }
 0x15d   : > { %v1315_v1 = vpop.f32.mrf.mxu0 }
 0x15e   : > { %v643_v2 = vmul.f32 %v1538_v61, %v1314_v63  ;;  %1543 = vtanh.f32 %v653_v0  ;;  %v1258_v61 = vld [vmem:[%s2073_s6] ss:$0 sm:$0xff] }
 0x15f   : > { %v1316_v4 = vpop.f32.mrf.mxu0 }
 0x160   : > { %v654_v5 = vadd.f32 %v1248_v60, %v643_v2  ;;  %v1317_v6 = vadd.f32 %v1316_v4, %v1315_v1 }
 0x161   : > { %v1318_v7 = vpop.f32.mrf.mxu0 }
 0x162   : > { %1545 = vtanh.f32 %v654_v5  ;;  %v644_v8 = vmul.f32 %v1540_v3, %v1317_v6 }
 0x163   : > { %v1319_v10 = vpop.f32.mrf.mxu0 }
 0x164   : > { %v1320_v11 = vadd.f32 %v1319_v10, %v1318_v7  ;;  %v655_v12 = vadd.f32 %v1248_v60, %v644_v8  ;;  %v933_v10 = vlaneseq }
 0x166   : > { %v645_v13 = vmul.f32 %v1542_v9, %v1320_v11  ;;  %1547 = vtanh.f32 %v655_v12  ;;  %v934_v11 = vshrl.u32 %v933_v10, 7 }
 0x168   : > { %v656_v14 = vadd.f32 %v1248_v60, %v645_v13  ;;  %v935_v12 = vsub.s32 0, %v934_v11  ;;  %v931_v13 = vld [vmem:[%s2075_s8] sm:$0x3] }
 0x16a   : > { %1549 = vtanh.f32 %v656_v14  ;;  %v939_v14 = vsub.s32 1, %v934_v11 }
 0x16b   : > { %v1544_v15 = vpop.eup %1543 }
 0x16f   : > { %v1546_v16 = vpop.eup %1545 }
 0x170   : > { %v661_v17 = vpack.c.bf16 %v1546_v16, %v1544_v15  ;;  %v936_v15 = vrot.slane %v931_v13, %v935_v12  ;;  %v940_v16 = vrot.slane %v931_v13, %v939_v14 }
 0x172   : > { %1357 = vmatprep.mubr.bf16.mxu1 %v661_v17 }
 0x173   : > { %v1548_v18 = vpop.eup %1547 }
 0x177   : > { %v1550_v19 = vpop.eup %1549 }
 0x178   : > { %v662_v20 = vpack.c.bf16 %v1550_v19, %v1548_v18 }
 0x17a   : > { %1358 = vmatmul.mubr.bf16.vlgmr.msra.gmra.mxu1 %v662_v20 }
 0x17b   : > { %1024 = vmatpush1.bf16.msra.mxu1 %v1511_v27  ;;  %1055 = vmatprep.mubr.bf16.mxu1 %v1782_v55 }
 0x17c   : > { %1025 = vmatprep.subr.bf16.mxu1 %v1516_v29 }
 0x17f   : > { %1026 = vmatpush1.bf16.msra.mxu1 %v1514_v30 }
 0x180   : > { %1027 = vmatprep.subr.bf16.mxu1 %v1519_v46 }
 0x183   : > { %1028 = vmatpush1.bf16.msra.mxu1 %v1517_v47 }
 0x184   : > { %1029 = vmatprep.subr.bf16.mxu1 %v1522_v48 }
 0x187   : > { %1030 = vmatpush1.bf16.msra.mxu1 %v1520_v49 }
 0x188   : > { %1031 = vmatprep.subr.bf16.mxu1 %v1525_v50 }
 0x18b   : > { %1032 = vmatpush1.bf16.msra.mxu1 %v1523_v51 }
 0x18c   : > { %1033 = vmatprep.subr.bf16.mxu1 %v1528_v52 }
 0x18f   : > { %1034 = vmatpush1.bf16.msra.mxu1 %v1526_v53 }
 0x190   : > { %1035 = vmatprep.subr.bf16.mxu1 %v1531_v54 }
 0x193   : > { %1036 = vmatpush1.bf16.msra.mxu1 %v1529_v56 }
 0x194   : > { %1037 = vmatprep.subr.bf16.mxu1 %v1534_v57 }
 0x197   : > { %1038 = vmatpush1.bf16.msra.mxu1 %v1532_v58 }
 0x23a   : > { %v1359_v31 = vpop.f32.mrf.mxu1 }
 0x23b   : > { %v777_v37 = vadd.f32 %v1359_v31, %v1249_v32 }
 0x23c   : > { %v768_v33 = vpop.f32.mrf.mxu1 }
 0x23d   : > { %v769_v34 = vadd.f32 %v1249_v32, %v768_v33 }
 0x23e   : > { %v1360_v35 = vpop.f32.mrf.mxu1 }
 0x23f   : > { %v780_v36 = vadd.f32 %v1360_v35, %v1249_v32  ;;  %1551 = vtanh.f32 %v769_v34 }
 0x240   : > { %v771_v38 = vpop.f32.mrf.mxu1 }
 0x241   : > { %v772_v39 = vadd.f32 %v1249_v32, %v771_v38  ;;  %1553 = vtanh.f32 %v780_v36 }
 0x243   : > { %1555 = vtanh.f32 %v772_v39 }
 0x244   : > { %1557 = vtanh.f32 %v777_v37 }
 0x24c   : > { %v1552_v40 = vpop.eup %1551 }
 0x24e   : > { %v1554_v41 = vpop.eup %1553 }
 0x250   : > { %v1556_v42 = vpop.eup %1555 }
 0x251   : > { %v1558_v43 = vpop.eup %1557  ;;  %v787_v44 = vpack.c.bf16 %v1556_v42, %v1552_v40 }
 0x252   : > { %v788_v45 = vpack.c.bf16 %v1554_v41, %v1558_v43 }
 0x253   : > { %1377 = vmatprep.mubr.bf16.mxu0 %v787_v44 }
 0x254   : > { %1378 = vmatmul.mubr.bf16.vlgmr.msra.gmra.mxu0 %v788_v45 }
 0x314   : > { %v1379_v59 = vpop.f32.mrf.mxu0 }
 0x315   : > { %v903_v3 = vadd.f32 %v1379_v59, %v1258_v61 }
 0x316   : > { %v894_v60 = vpop.f32.mrf.mxu0 }
 0x317   : > { %v895_v62 = vadd.f32 %v1258_v61, %v894_v60 }
 0x318   : > { %v1380_v63 = vpop.f32.mrf.mxu0 }
 0x319   : > { %1559 = vtanh.f32 %v895_v62  ;;  %v906_v2 = vadd.f32 %v1380_v63, %v1258_v61 }
 0x31a   : > { %v897_v0 = vpop.f32.mrf.mxu0 }
 0x31b   : > { %v898_v1 = vadd.f32 %v1258_v61, %v897_v0 }
 0x31d   : > { %1561 = vtanh.f32 %v898_v1 }
 0x31e   : > { %1563 = vtanh.f32 %v906_v2 }
 0x31f   : > { %1565 = vtanh.f32 %v903_v3 }
 0x326   : > { %v1560_v4 = vpop.eup %1559 }
 0x32a   : > { %v1562_v5 = vpop.eup %1561 }
 0x32b   : > { %v913_v6 = vpack.c.bf16 %v1562_v5, %v1560_v4  ;;  %v1564_v7 = vpop.eup %1563 }
 0x32c   : > { %v1566_v8 = vpop.eup %1565 }
 0x32d   : > { %1056 = vmatmul.mubr.bf16.vlgmr.msra.gmra.mxu1 %v913_v6  ;;  %v914_v9 = vpack.c.bf16 %v1564_v7, %v1566_v8 }
 0x32e   : > { %1065 = vmatprep.mubr.bf16.mxu1 %v1782_v55 }
 0x335   : > { %1066 = vmatmul.mubr.bf16.gmra.mxu1 %v914_v9 }
 0x3ed   : > { %v1057_v17 = vpop.f32.mrf.mxu1 }
 0x3ee   : > { %v1058_v18 = vadd.f32 %v1057_v17, %v936_v15 }
 0x3ef   : > { %v1059_v19 = vpop.f32.mrf.mxu1 }
 0x3f0   : > { %1076 = vst [vmem:[%s409_s1] sm:$0xff] %v1058_v18  ;;  %v1060_v20 = vadd.f32 %v1059_v19, %v940_v16 }
 0x3f1   : > { %v1061_v21 = vpop.f32.mrf.mxu1 }
 0x3f2   : > { %1077 = vst [vmem:[%s409_s1 + $0x8] sm:$0xff] %v1060_v20  ;;  %v1062_v22 = vadd.f32 %v1061_v21, %v936_v15 }
 0x3f3   : > { %v1063_v23 = vpop.f32.mrf.mxu1 }
 0x3f4   : > { %1078 = vst [vmem:[%s409_s1 + $0x10] sm:$0xff] %v1062_v22  ;;  %v1064_v24 = vadd.f32 %v1063_v23, %v940_v16 }
 0x3f5   : > { %v1067_v25 = vpop.f32.mrf.mxu1 }
 0x3f6   : > { %1079 = vst [vmem:[%s409_s1 + $0x18] sm:$0xff] %v1064_v24  ;;  %v1068_v26 = vadd.f32 %v1067_v25, %v936_v15 }
 0x3f7   : > { %v1069_v27 = vpop.f32.mrf.mxu1 }
 0x3f8   : > { %1080 = vst [vmem:[%s409_s1 + $0x20] sm:$0xff] %v1068_v26  ;;  %v1070_v28 = vadd.f32 %v1069_v27, %v940_v16 }
 0x3f9   : > { %v1071_v29 = vpop.f32.mrf.mxu1 }
 0x3fa   : > { %1081 = vst [vmem:[%s409_s1 + $0x28] sm:$0xff] %v1070_v28  ;;  %v1072_v30 = vadd.f32 %v1071_v29, %v936_v15 }
 0x3fb   : > { %v1073_v31 = vpop.f32.mrf.mxu1 }
 0x3fc   : > { %1082 = vst [vmem:[%s409_s1 + $0x30] sm:$0xff] %v1072_v30  ;;  %v1074_v32 = vadd.f32 %v1073_v31, %v940_v16 }
 0x3fe   : > { %1083 = vst [vmem:[%s409_s1 + $0x38] sm:$0xff] %v1074_v32 }
 0x3ff   : > { %1712 = shalt.err (!%p1709_p5)
}
 0x400   : > { %s1713_s19 = scalar_lea.hbm %s2025_s15, 1024  ;;  %s1717_s28 = scalar_lea.hbm %s2076_s9, 4096 }
 0x401   : > { %p1714_p0 = scmp.ne.s32.totalorder %s2025_s15, %s1713_s19  ;;  %p1718_p10 = scmp.lt.s32.totalorder %s2025_s15, %s2076_s9 }
 0x402   : > { %p1719_p4 = scmp.lt.s32.totalorder %s1717_s28, %s1713_s19 }
 0x403   : > { %p1715_p8 = pnand %p1714_p0, %p2104_p1 }
 0x404   : > { %p1720_p7 = por %p1719_p4, %p1718_p10 }
 0x405   : > { %p1716_p6 = pneg %p1715_p8 }
 0x407   : > { %p1721_p11 = pnand %p1720_p7, %p1716_p6 }
 0x409   : > { %1724 = shalt.err (!%p1721_p11)
}
 0x40a   : > { %s1784_s22 = smov 256   ;;  %s1785_s26 = smov 16  }
 0x40b   : > { %1399 = dma.vmem_to_hbm [thread:$0]  (%p2104_p1), %s2020_s29, 1024, %s2025_s15, %s1085_s17, %s1784_s22, %s1784_s22, %s1785_s26  }
 0x40c PF: > { %p1431_p9 = scmp.ge.s32.totalorder %s1771_s12, 2  ;;  %s1114_s14 = sand.u32 1, %s1759_s30  }
 0x40d   : > { %p2105_p12 = scmp.ne.s32.totalorder %s2087_s16, 0  ;;  %s1115_s13 = scalar_lea.sflag [#allocation4], %s1114_s14 }
 0x40f   : > { %p1419_p2 = pnand %p1431_p9, %p2105_p12 }
 0x411   : > { %p1420_p13 = pneg %p1419_p2 }
 0x413   : > { %1754 = dma.done.wait (%p1420_p13), %s1115_s13, 1024  }
 0x414   : > { %1756 = vsyncadd (%p1420_p13), %s1115_s13, 4294966272  ;;  %p24_p3 = scmp.ge.s32.totalorder %s1926_s18, 6   ;;  %s2106_s30 = smov %s1763_s10 }
 0x415   : > { %s2107_s10 = smov %s1767_s11  ;;  %s2108_s11 = smov %s1935_s23 }
 0x416   : > { %s2109_s12 = smov %s1926_s18  ;;  %26 = sbr.rel (!%p24_p3) target bundleno = 11 (0xb), region = 117 }
 0x41b   :  { %1120 = vsyncpa [#allocation3], 1 }
 0x41c   :  { %1122 = vsyncpa [#allocation3 + $0x1], 1 }
 0x41d   :  { %1123 = vsyncpa [#allocation6], 1 }
 0x41e   :  { %1124 = vsyncpa [#allocation9], 1 }
 0x41f   :  { %1125 = vsyncpa [#allocation4], 1 }
 0x420   :  { %1127 = vsyncpa [#allocation4 + $0x1], 1 }

// kernel: tpu_custom_call.1
= control target key start
LH: loop header
LB: loop body
LE: loop exit
PB: predicated region body
PF: predicated region fallthrough
CT: control target
= control target key end

     0   :  { %s2067_s0 = inlined_call_operand.hbm [shape: bf16[128,256], index: 0, kind: input, shape index: {}]   ;;  %s2068_s1 = inlined_call_operand.hbm [shape: bf16[256,128], index: 1, kind: input, shape index: {}]   ;;  %s2069_s2 = inlined_call_operand.vmem [shape: f32[1,128], index: 2, kind: input, shape index: {}]   ;;  %s2070_s3 = inlined_call_operand.hbm [shape: bf16[128,128], index: 3, kind: input, shape index: {}]   ;;  %s2071_s4 = inlined_call_operand.vmem [shape: f32[1,128], index: 4, kind: input, shape index: {}]   ;;  %s2072_s5 = inlined_call_operand.hbm [shape: bf16[128,128], index: 5, kind: input, shape index: {}]   ;;  %s2073_s6 = inlined_call_operand.vmem [shape: f32[1,128], index: 6, kind: input, shape index: {}]   ;;  %s2074_s7 = inlined_call_operand.hbm [shape: bf16[128,256], index: 7, kind: input, shape index: {}]   ;;  %s2075_s8 = inlined_call_operand.vmem [shape: f32[1,256], index: 8, kind: input, shape index: {}]   ;;  %s2076_s9 = inlined_call_operand.hbm [shape: f32[128,256], index: 9, kind: output, shape index: {}]  }
   0x1   :  { %2083 = sst [smem:[#allocation16_spill]] %s2068_s1 }
   0x2   :  { %2084 = sst [smem:[#allocation17_spill]] %s2070_s3 }
   0x3   :  { %2085 = sst [smem:[#allocation18_spill]] %s2072_s5 }
   0x4   :  { %14 = vsyncpa [#allocation3], 0 }
   0x5   :  { %16 = vsyncpa [#allocation3 + $0x1], 0 }
   0x6   :  { %17 = vsyncpa [#allocation6], 0 }
   0x7   :  { %18 = vsyncpa [#allocation9], 0 }
   0x8   :  { %19 = vsyncpa [#allocation4], 0 }
   0x9   :  { %21 = vsyncpa [#allocation4 + $0x1], 0  ;;  %s1836_s30 = smov 0   ;;  %s1838_s10 = smov 0  }
   0xa   :  { %s1840_s11 = smov 0   ;;  %s1842_s12 = smov 0  }
   0xb LB: > { %s1857_s13 = sadd.s32 4294967295, %s1771_s12   ;;  %s1210_s14 = sadd.s32 4294967294, %s1771_s12   ;;  %s1771_s12 = sphi %s1842_s12, %s2109_s12   ;;  %s1767_s11 = sphi %s1840_s11, %s2108_s11   ;;  %s1763_s10 = sphi %s1838_s10, %s2107_s10   ;;  %s1759_s30 = sphi %s1836_s30, %s2106_s30  }
   0xc   : > { %p47_p0 = scmp.ne.s32.totalorder %s1763_s10, %s1759_s30  ;;  %p2077_p1 = scmp.eq.s32.totalorder %s1857_s13, 0 }
   0xd   : > { %p245_p3 = scmp.eq.s32.totalorder %s1210_s14, 3  ;;  %p1211_p5 = scmp.ge.s32.totalorder %s1771_s12, 1 }
   0xe   : > { %p1866_p4 = por %p2077_p1, %p47_p0  ;;  %p252_p7 = scmp.lt.s32.totalorder %s1771_s12, 5 }
   0xf   : > { %p1871_p6 = por %p245_p3, %p47_p0  ;;  %s1773_s18 = smov [#allocation5]  }
  0x10   : > { %s2086_s15 = scalar_select %p1866_p4, 1, 0 }
  0x11   : > { %s2087_s16 = scalar_select %p1871_p6, 1, 0 }
  0x12   : > { %p1876_p8 = pnand %p1211_p5, %p252_p7  ;;  %s264_s19 = sshll.u32 %s1773_s18, 4  ;;  %s265_s19 = int_to_ptr.vmem [resolvable:$true] %s264_s19 }
  0x13   : > { %s1774_s21 = smov [#allocation8]   ;;  %s1775_s23 = smov [#allocation7]  }
  0x14   : > { %s2088_s17 = scalar_select %p1876_p8, 1, 0 }
  0x15   : > { %p1401_p9 = pneg %p1876_p8  ;;  %s296_s22 = sshll.u32 %s1774_s21, 4  ;;  %s297_s22 = int_to_ptr.vmem [resolvable:$true] %s296_s22 }
  0x16   : > { %s280_s24 = sshll.u32 %s1775_s23, 4  ;;  %s1578_s25 = scalar_lea.vmem %s265_s19, 2048  ;;  %s281_s24 = int_to_ptr.vmem [resolvable:$true] %s280_s24 }
  0x17   : > { %p1884_p10 = pnand %p1401_p9, %p2077_p1  ;;  %p1579_p12 = scmp.ne.s32.totalorder %s265_s19, %s1578_s25 }
  0x18   : > { %p1586_p3 = scmp.lt.s32.totalorder %s265_s19, %s265_s19  ;;  %p1587_p5 = scmp.lt.s32.totalorder %s1578_s25, %s1578_s25 }
  0x19   : > { %p1569_p11 = pneg %p1884_p10 }
  0x1a   : > { %p1588_p7 = por %p1587_p5, %p1586_p3 }
  0x1b   : > { %p1581_p13 = pnand %p1579_p12, %p1569_p11 }
  0x1d   : > { %p1582_p0 = pneg %p1581_p13 }
  0x1f   : > { %p1589_p9 = pnand %p1588_p7, %p1582_p0 }
  0x21   : > { %1592 = shalt.err (!%p1589_p9)
}
  0x22   : > { %s1776_s26 = smov 64   ;;  %s1777_s27 = smov 4  }
  0x23   : > { %s2090_s1 = sld [smem:[#allocation16_spill]]  ;;  %s1604_s14 = scalar_lea.vmem %s297_s22, 1024 }
  0x24   : > { %p1605_p1 = scmp.ne.s32.totalorder %s297_s22, %s1604_s14  ;;  %p1612_p2 = scmp.lt.s32.totalorder %s297_s22, %s297_s22 }
  0x25   : > { %p1613_p6 = scmp.lt.s32.totalorder %s1604_s14, %s1604_s14 }
  0x26   : > { %p1607_p12 = pnand %p1605_p1, %p1569_p11 }
  0x27   : > { %p1614_p3 = por %p1613_p6, %p1612_p2 }
  0x28   : > { %p1608_p13 = pneg %p1607_p12 }
  0x29   : > { %1404 = dma.hbm_to_vmem [thread:$0]  (!%p1884_p10), %s2090_s1, 2048, %s265_s19, [#allocation6], %s1776_s26, %s1776_s26, %s1777_s27  }
  0x2a   : > { %p1615_p0 = pnand %p1614_p3, %p1608_p13 }
  0x2c   : > { %1618 = shalt.err (!%p1615_p0)
}
  0x2d   : > { %s2091_s5 = sld [smem:[#allocation18_spill]]  ;;  %s1630_s19 = scalar_lea.vmem %s281_s24, 1024 }
  0x2e   : > { %p1631_p5 = scmp.ne.s32.totalorder %s281_s24, %s1630_s19  ;;  %p1638_p9 = scmp.lt.s32.totalorder %s281_s24, %s281_s24 }
  0x2f   : > { %p1639_p12 = scmp.lt.s32.totalorder %s1630_s19, %s1630_s19 }
  0x30   : > { %p1633_p7 = pnand %p1631_p5, %p1569_p11 }
  0x31   : > { %p1640_p4 = por %p1639_p12, %p1638_p9 }
  0x32   : > { %p1634_p1 = pneg %p1633_p7 }
  0x33   : > { %1410 = dma.hbm_to_vmem [thread:$0]  (!%p1884_p10), %s2091_s5, 1024, %s297_s22, [#allocation9], %s1776_s26, %s1776_s26, %s1777_s27  }
  0x34   : > { %p1641_p2 = pnand %p1640_p4, %p1634_p1 }
  0x36   : > { %1644 = shalt.err (!%p1641_p2)
}
  0x37   : > { %s2092_s3 = sld [smem:[#allocation17_spill]]  ;;  %s1778_s22 = smov [#allocation10]  }
  0x38   : > { %s312_s28 = sshll.u32 %s1778_s22, 4  ;;  %s313_s28 = int_to_ptr.vmem [resolvable:$true] %s312_s28 }
  0x39   : > { %s1656_s29 = scalar_lea.vmem %s313_s28, 2048  ;;  %p1664_p0 = scmp.lt.s32.totalorder %s313_s28, %s313_s28 }
  0x3a   : > { %p1657_p6 = scmp.ne.s32.totalorder %s313_s28, %s1656_s29  ;;  %p1665_p5 = scmp.lt.s32.totalorder %s1656_s29, %s1656_s29 }
  0x3c   : > { %p1659_p13 = pnand %p1657_p6, %p1569_p11  ;;  %p1666_p4 = por %p1665_p5, %p1664_p0 }
  0x3d   : > { %1407 = dma.hbm_to_vmem [thread:$0]  (!%p1884_p10), %s2092_s3, 1024, %s281_s24, [#allocation6], %s1776_s26, %s1776_s26, %s1777_s27  }
  0x3e   : > { %p1660_p3 = pneg %p1659_p13 }
  0x40   : > { %p1667_p7 = pnand %p1666_p4, %p1660_p3 }
  0x42   : > { %1670 = shalt.err (!%p1667_p7)
}
  0x43   : > { %s2079_s14 = smov 128   ;;  %s2080_s24 = smov 8  }
  0x44   : > { %1413 = dma.hbm_to_vmem [thread:$0]  (!%p1884_p10), %s2074_s7, 2048, %s313_s28, [#allocation9], %s2079_s14, %s2079_s14, %s2080_s24  }
  0x45   : > { %s1926_s18 = sadd.s32 1, %s1771_s12   ;;  %s34_s19 = sadd.s32 1, %s1767_s11 }
  0x46   : > { %s31_s21 = ssub.s32 %s1771_s12, %s1926_s18  ;;  %p41_p1 = scmp.ne.s32.totalorder %s1767_s11, %s1763_s10 }
  0x47   : > { %p32_p11 = scmp.eq.s32.totalorder %s31_s21, 0  ;;  %p42_p9 = scmp.eq.s32.totalorder %s1771_s12, 0 }
  0x48   : > { %p2093_p2 = scmp.eq.s32.totalorder %s1857_s13, 3  ;;  %p1426_p13 = scmp.lt.s32.totalorder %s1771_s12, 4 }
  0x49   : > { %s1935_s23 = scalar_select %p32_p11, %s1767_s11, %s34_s19  }
  0x4a   : > { %p43_p12 = por %p42_p9, %p41_p1  ;;  %p1939_p6 = por %p2093_p2, %p41_p1 }
  0x4b   : > { %s329_s25 = sand.u32 1, %s1767_s11   ;;  %s1290_s28 = sshll.u32 %s1771_s12, 9 }
  0x4c   : > { %s2094_s20 = scalar_select %p1939_p6, 1, 0 }
  0x4d   : > { %s1217_s22 = sshll.u32 %s329_s25, 5  ;;  %s1949_s27 = scalar_lea.hbm %s2067_s0, %s1290_s28 }
  0x4e   : > { %s333_s21 = scalar_lea.vmem [#allocation2], %s1217_s22  ;;  %p1953_p10 = pnand %p1426_p13, %p43_p12 }
  0x4f   : > { %s341_s19 = sshll.u32 %s333_s21, 4  ;;  %s1957_s24 = scalar_lea.sflag [#allocation3], %s329_s25  ;;  %s1951_s19 = int_to_ptr.vmem [resolvable:$true] %s341_s19 }
  0x50   : > { %s1671_s1 = scalar_lea.hbm %s1949_s27, 512  ;;  %p1673_p0 = pneg %p1953_p10 }
  0x51   : > { %p1672_p3 = scmp.ne.s32.totalorder %s1949_s27, %s1671_s1  ;;  %s1676_s22 = scalar_lea.hbm %s2067_s0, 2048 }
  0x52   : > { %p1677_p7 = scmp.lt.s32.totalorder %s1949_s27, %s2067_s0  ;;  %p1678_p11 = scmp.lt.s32.totalorder %s1676_s22, %s1671_s1 }
  0x53   : > { %p1674_p5 = pnand %p1673_p0, %p1672_p3 }
  0x54   : > { %p1679_p1 = por %p1678_p11, %p1677_p7 }
  0x55   : > { %p1675_p4 = pneg %p1674_p5 }
  0x57   : > { %p1680_p9 = pnand %p1679_p1, %p1675_p4 }
  0x59   : > { %1683 = shalt.err (!%p1680_p9)
}
  0x5a   : > { %s1684_s25 = scalar_lea.vmem %s1951_s19, 512  ;;  %s1781_s3 = smov [#allocation2]  }
  0x5b   : > { %p1685_p12 = scmp.ne.s32.totalorder %s1951_s19, %s1684_s25  ;;  %s1689_s5 = sshll.u32 %s1781_s3, 4  ;;  %s1690_s5 = int_to_ptr.vmem [resolvable:$false] %s1689_s5 }
  0x5c   : > { %s1691_s28 = scalar_lea.vmem %s1690_s5, 1024  ;;  %p1692_p3 = scmp.lt.s32.totalorder %s1951_s19, %s1690_s5 }
  0x5d   : > { %p1687_p2 = pnand %p1685_p12, %p1673_p0  ;;  %p1693_p5 = scmp.lt.s32.totalorder %s1691_s28, %s1684_s25 }
  0x5f   : > { %p1688_p13 = pneg %p1687_p2  ;;  %p1694_p6 = por %p1693_p5, %p1692_p3 }
  0x61   : > { %p1695_p8 = pnand %p1694_p6, %p1688_p13 }
  0x63   : > { %1698 = shalt.err (!%p1695_p8)
}
  0x64   : > { %s2096_s1 = smov 8   ;;  %s2097_s29 = smov 128  }
  0x65   : > { %1417 = dma.hbm_to_vmem [thread:$0]  (!%p1953_p10), %s1949_s27, 512, %s1951_s19, %s1957_s24, %s2097_s29, %s2097_s29, %s2096_s1  }
  0x66   : > { %p2098_p0 = scmp.ne.s32.totalorder %s2088_s17, 0 }
  0x67   : > { %s1984_s3 = sand.u32 (!%p2098_p0), 1, %s1763_s10   ;;  %p2099_p8 = scmp.ne.s32.totalorder (!%p2098_p0), %s2086_s15, 0 }
  0x68   : > { %353 = sbr.rel (%p2098_p0) target bundleno = 1036 (0x40c), region = 56  ;;  %s1222_s5 = sshll.u32 (!%p2098_p0), %s1984_s3, 5 }
  0x69   : > { %s356_s22 = scalar_lea.sflag (!%p2098_p0), [#allocation3], %s1984_s3  ;;  %s1988_s26 = scalar_lea.vmem (!%p2098_p0), [#allocation2], %s1222_s5 }
  0x6d   : > { %1742 = dma.done.wait (%p2099_p8), %s356_s22, 512  }
  0x6e   : > { %1744 = vsyncadd (%p2099_p8), %s356_s22, 4294966784  ;;  %p2100_p6 = scmp.eq.s32.totalorder %s1857_s13, 0 }
  0x70   : > { %1746 = dma.done.wait (%p2100_p6), [#allocation6], 3072   ;;  %p2101_p10 = pmov %p2100_p6 }
  0x71   : > { %p2102_p4 = pmov %p2100_p6 }
  0x72   : > { %1748 = vsyncadd (%p2101_p10), [#allocation6], 4294964224 }
  0x73   : > { %1750 = dma.done.wait (%p2102_p4), [#allocation9], 3072   ;;  %p2103_p7 = pmov %p2102_p4 }
  0x74   : > { %v1475_v0 = vld [vmem:[#allocation5 + $0x78] sm:$0xff]   ;;  %v1477_v2 = vld [vmem:[#allocation5 + $0x70] sm:$0xff]   ;;  %v1479_v4 = vld [vmem:[#allocation5 + $0x68] sm:$0xff]   ;;  %s1227_s28 = sshll.u32 %s1984_s3, 6  ;;  %s1292_s5 = sshll.u32 %s1857_s13, 10 }
  0x75   : > { %1752 = vsyncadd (%p2103_p7), [#allocation9], 4294964224  ;;  %v1476_v1 = vld [vmem:[#allocation5 + $0x38] sm:$0xff]   ;;  %1293 = vmatprep.subr.bf16.mxu0 %v1475_v0  ;;  %v1478_v3 = vld [vmem:[#allocation5 + $0x30] sm:$0xff]   ;;  %s409_s1 = scalar_lea.vmem [#allocation11], %s1227_s28  ;;  %s2025_s15 = scalar_lea.hbm %s2076_s9, %s1292_s5 }
  0x76   : > { %1294 = vmatpush3.bf16.msra.mxu0 %v1476_v1  ;;  %v1480_v5 = vld [vmem:[#allocation5 + $0x28] sm:$0xff]   ;;  %v1481_v6 = vld [vmem:[#allocation5 + $0x60] sm:$0xff]   ;;  %v1483_v8 = vld [vmem:[#allocation5 + $0x58] sm:$0xff]   ;;  %s1099_s29 = sshll.u32 %s409_s1, 4  ;;  %s1085_s17 = scalar_lea.sflag [#allocation4], %s1984_s3  ;;  %s2020_s29 = int_to_ptr.vmem [resolvable:$true] %s1099_s29 }
  0x77   : > { %1295 = vmatprep.subr.bf16.mxu0 %v1477_v2  ;;  %v1482_v7 = vld [vmem:[#allocation5 + $0x20] sm:$0xff]   ;;  %v1484_v9 = vld [vmem:[#allocation5 + $0x18] sm:$0xff]   ;;  %v1485_v10 = vld [vmem:[#allocation5 + $0x50] sm:$0xff]   ;;  %s1699_s14 = scalar_lea.vmem %s2020_s29, 1024  ;;  %p2104_p1 = scmp.ne.s32.totalorder %s2094_s20, 0 }
  0x78   : > { %v413_v11 = vld [vmem:[%s1988_s26] sm:$0xff]  ;;  %v414_v12 = vld [vmem:[%s1988_s26 + $0x8] sm:$0xff]  ;;  %v415_v13 = vld [vmem:[%s1988_s26 + $0x10] sm:$0xff]  ;;  %p1700_p11 = scmp.ne.s32.totalorder %s2020_s29, %s1699_s14  ;;  %s1783_s13 = smov [#allocation11]  }
  0x79   : > { %v1486_v14 = vld [vmem:[#allocation5 + $0x10] sm:$0xff]   ;;  %v1229_v15 = vcombine.high %v413_v11, %v414_v12  ;;  %v416_v16 = vld [vmem:[%s1988_s26 + $0x18] sm:$0xff]  ;;  %v417_v17 = vunpack.c.l.bf16 %v413_v11  ;;  %v418_v18 = vunpack.c.h.bf16 %v413_v11  ;;  %v1487_v19 = vld [vmem:[#allocation5 + $0x48] sm:$0xff]   ;;  %v419_v20 = vunpack.c.l.bf16 %v414_v12  ;;  %s1703_s24 = sshll.u32 %s1783_s13, 4  ;;  %s1704_s24 = int_to_ptr.vmem [resolvable:$false] %s1703_s24 }
  0x7a   : > { %1296 = vmatpush3.bf16.msra.mxu0 %v1478_v3  ;;  %v420_v21 = vunpack.c.h.bf16 %v414_v12  ;;  %v421_v23 = vunpack.c.l.bf16 %v415_v13  ;;  %v422_v24 = vunpack.c.h.bf16 %v415_v13  ;;  %v423_v25 = vunpack.c.l.bf16 %v416_v16  ;;  %v1488_v27 = vld [vmem:[#allocation5 + $0x8] sm:$0xff]   ;;  %v1489_v30 = vld [vmem:[#allocation5 + $0x40] sm:$0xff]   ;;  %v1495_v36 = vld [vmem:[#allocation7 + $0x38] sm:$0xff]   ;;  %p1701_p9 = pnand %p1700_p11, %p2104_p1  ;;  %s1705_s27 = scalar_lea.vmem %s1704_s24, 2048 }
  0x7b   : > { %1297 = vmatprep.subr.bf16.mxu0 %v1479_v4  ;;  %625 = vmatprep.mubr.bf16.mxu0 %v1229_v15  ;;  %v425_v22 = vadd.f32 %v418_v18, %v417_v17  ;;  %v424_v26 = vunpack.c.h.bf16 %v416_v16  ;;  %v1490_v32 = vld [vmem:[#allocation5] sm:$0xff]   ;;  %v1228_v33 = vcombine.low %v413_v11, %v414_v12  ;;  %v1231_v34 = vcombine.high %v415_v13, %v416_v16  ;;  %v1496_v37 = vld [vmem:[#allocation7 + $0x30] sm:$0xff]   ;;  %v1497_v38 = vld [vmem:[#allocation7 + $0x28] sm:$0xff]   ;;  %p1706_p2 = scmp.lt.s32.totalorder %s2020_s29, %s1704_s24  ;;  %p1707_p13 = scmp.lt.s32.totalorder %s1705_s27, %s1699_s14 }
  0x7c   : > { %v428_v28 = vadd.f32 %v420_v21, %v419_v20  ;;  %v431_v29 = vadd.f32 %v422_v24, %v421_v23  ;;  %v1230_v35 = vcombine.low %v415_v13, %v416_v16  ;;  %1341 = vmatprep.subr.bf16.mxu1 %v1495_v36  ;;  %v1498_v39 = vld [vmem:[#allocation7 + $0x20] sm:$0xff]   ;;  %v1499_v40 = vld [vmem:[#allocation7 + $0x18] sm:$0xff]   ;;  %v1500_v41 = vld [vmem:[#allocation7 + $0x10] sm:$0xff]   ;;  %p1702_p12 = pneg %p1701_p9 }
  0x7d   : > { %426 = vadd.xlane.f32.xlu0 %v425_v22  ;;  %v434_v31 = vadd.f32 %v424_v26, %v423_v25  ;;  %1342 = vmatpush3.bf16.msra.mxu1 %v1495_v36  ;;  %v1501_v42 = vld [vmem:[#allocation7 + $0x8] sm:$0xff]   ;;  %v1502_v43 = vld [vmem:[#allocation7] sm:$0xff]   ;;  %v1503_v44 = vld [vmem:[#allocation8 + $0x38] sm:$0xff]   ;;  %p1708_p3 = por %p1707_p13, %p1706_p2 }
  0x7e   : > { %1298 = vmatpush3.bf16.msra.mxu0 %v1480_v5  ;;  %432 = vadd.xlane.f32.xlu1 %v431_v29  ;;  %v1504_v45 = vld [vmem:[#allocation8 + $0x30] sm:$0xff]   ;;  %v1248_v60 = vld [vmem:[%s2069_s2] ss:$0 sm:$0xff]  ;;  %v1505_v21 = vld [vmem:[#allocation8 + $0x28] sm:$0xff]  }
  0x7f   : > { %1299 = vmatprep.subr.bf16.mxu0 %v1481_v6  ;;  %1343 = vmatprep.subr.bf16.mxu1 %v1496_v37  ;;  %v1506_v22 = vld [vmem:[#allocation8 + $0x20] sm:$0xff]   ;;  %v1507_v23 = vld [vmem:[#allocation8 + $0x18] sm:$0xff]   ;;  %v1508_v24 = vld [vmem:[#allocation8 + $0x10] sm:$0xff]   ;;  %p1709_p5 = pnand %p1708_p3, %p1702_p12 }
  0x80   : > { %v1509_v25 = vld [vmem:[#allocation8 + $0x8] sm:$0xff]   ;;  %v1510_v26 = vld [vmem:[#allocation8] sm:$0xff]  }
  0x81   : > { %429 = vadd.xlane.f32.xlu0 %v428_v28  ;;  %1344 = vmatpush3.bf16.msra.mxu1 %v1496_v37  ;;  %v1513_v28 = vld [vmem:[#allocation10 + $0x74] ss:$8 sps:$4 sm:$0xff]   ;;  %v1516_v29 = vld [vmem:[#allocation10 + $0x64] ss:$8 sps:$4 sm:$0xff]  }
  0x82   : > { %1300 = vmatpush3.bf16.msra.mxu0 %v1482_v7  ;;  %435 = vadd.xlane.f32.xlu1 %v434_v31 }
  0x83   : > { %1301 = vmatprep.subr.bf16.mxu0 %v1483_v8  ;;  %1345 = vmatprep.subr.bf16.mxu1 %v1497_v38 }
  0x85   : > { %1346 = vmatpush3.bf16.msra.mxu1 %v1497_v38 }
  0x86   : > { %1302 = vmatpush3.bf16.msra.mxu0 %v1484_v9  ;;  %1347 = vmatprep.subr.bf16.mxu1 %v1498_v39 }
  0x87   : > { %1303 = vmatprep.subr.bf16.mxu0 %v1485_v10 }
  0x89   : > { %1348 = vmatpush3.bf16.msra.mxu1 %v1498_v39 }
  0x8a   : > { %1304 = vmatpush3.bf16.msra.mxu0 %v1486_v14  ;;  %1349 = vmatprep.subr.bf16.mxu1 %v1499_v40 }
  0x8b   : > { %1305 = vmatprep.subr.bf16.mxu0 %v1487_v19 }
  0x8d   : > { %1350 = vmatpush3.bf16.msra.mxu1 %v1499_v40 }
  0x8e   : > { %1306 = vmatpush3.bf16.msra.mxu0 %v1488_v27  ;;  %1351 = vmatprep.subr.bf16.mxu1 %v1500_v41  ;;  %v1511_v27 = vld [vmem:[#allocation10 + $0x70] ss:$8 sps:$4 sm:$0xff]  }
  0x8f   : > { %1307 = vmatprep.subr.bf16.mxu0 %v1489_v30  ;;  %v1514_v30 = vld [vmem:[#allocation10 + $0x60] ss:$8 sps:$4 sm:$0xff]  }
  0x91   : > { %1352 = vmatpush3.bf16.msra.mxu1 %v1500_v41 }
  0x92   : > { %1308 = vmatpush3.bf16.msra.mxu0 %v1490_v32  ;;  %1353 = vmatprep.subr.bf16.mxu1 %v1501_v42  ;;  %v1249_v32 = vld [vmem:[%s2071_s4] ss:$0 sm:$0xff] }
  0x93   : > { %1361 = vmatprep.subr.bf16.mxu0 %v1503_v44 }
  0x95   : > { %626 = vmatmul.mubr.bf16.vlgmr.msra.gmra.mxu0 %v1228_v33  ;;  %1354 = vmatpush3.bf16.msra.mxu1 %v1501_v42 }
  0x96   : > { %633 = vmatprep.mubr.bf16.mxu0 %v1231_v34  ;;  %1355 = vmatprep.subr.bf16.mxu1 %v1502_v43 }
  0x97   : > { %1362 = vmatpush3.bf16.msra.mxu0 %v1503_v44 }
  0x98   : > { %1363 = vmatprep.subr.bf16.mxu0 %v1504_v45 }
  0x99   : > { %1356 = vmatpush3.bf16.msra.mxu1 %v1502_v43 }
  0x9a   : > { %1023 = vmatprep.subr.bf16.mxu1 %v1513_v28 }
  0x9b   : > { %1364 = vmatpush3.bf16.msra.mxu0 %v1504_v45 }
  0x9c   : > { %1365 = vmatprep.subr.bf16.mxu0 %v1505_v21 }
  0x9d   : > { %634 = vmatmul.mubr.bf16.gmra.mxu0 %v1230_v35 }
  0x9f   : > { %1366 = vmatpush3.bf16.msra.mxu0 %v1505_v21 }
  0xa0   : > { %1367 = vmatprep.subr.bf16.mxu0 %v1506_v22 }
  0xa3   : > { %1368 = vmatpush3.bf16.msra.mxu0 %v1506_v22 }
  0xa4   : > { %1369 = vmatprep.subr.bf16.mxu0 %v1507_v23 }
  0xa7   : > { %1370 = vmatpush3.bf16.msra.mxu0 %v1507_v23 }
  0xa8   : > { %1371 = vmatprep.subr.bf16.mxu0 %v1508_v24 }
  0xab   : > { %1372 = vmatpush3.bf16.msra.mxu0 %v1508_v24 }
  0xac   : > { %1373 = vmatprep.subr.bf16.mxu0 %v1509_v25 }
  0xaf   : > { %1374 = vmatpush3.bf16.msra.mxu0 %v1509_v25 }
  0xb0   : > { %1375 = vmatprep.subr.bf16.mxu0 %v1510_v26 }
  0xb3   : > { %1376 = vmatpush3.bf16.msra.mxu0 %v1510_v26 }
 0x106   : > { %v427_v46 = vpop.xlane.xlu0 %426 }
 0x107   : > { %v437_v47 = vmax.f32 %v427_v46, 1e-24  ;;  %v433_v49 = vpop.xlane.xlu1 %432  ;;  %v1519_v46 = vld [vmem:[#allocation10 + $0x54] ss:$8 sps:$4 sm:$0xff]  }
 0x108   : > { %v439_v51 = vmax.f32 %v433_v49, 1e-24  ;;  %v1520_v49 = vld [vmem:[#allocation10 + $0x40] ss:$8 sps:$4 sm:$0xff]  }
 0x109   : > { %1535 = vrsqrt.f32 %v437_v47  ;;  %v1517_v47 = vld [vmem:[#allocation10 + $0x50] ss:$8 sps:$4 sm:$0xff]  }
 0x10a   : > { %v430_v48 = vpop.xlane.xlu0 %429 }
 0x10b   : > { %v438_v50 = vmax.f32 %v430_v48, 1e-24  ;;  %v436_v52 = vpop.xlane.xlu1 %435  ;;  %v1522_v48 = vld [vmem:[#allocation10 + $0x44] ss:$8 sps:$4 sm:$0xff]  }
 0x10c   : > { %v440_v53 = vmax.f32 %v436_v52, 1e-24  ;;  %v1528_v52 = vld [vmem:[#allocation10 + $0x24] ss:$8 sps:$4 sm:$0xff]  }
 0x10d   : > { %1537 = vrsqrt.f32 %v438_v50  ;;  %v1525_v50 = vld [vmem:[#allocation10 + $0x34] ss:$8 sps:$4 sm:$0xff]  }
 0x10e   : > { %1539 = vrsqrt.f32 %v439_v51  ;;  %v1523_v51 = vld [vmem:[#allocation10 + $0x30] ss:$8 sps:$4 sm:$0xff]  }
 0x10f   : > { %1541 = vrsqrt.f32 %v440_v53  ;;  %v1526_v53 = vld [vmem:[#allocation10 + $0x20] ss:$8 sps:$4 sm:$0xff]  }
 0x116   : > { %v1536_v55 = vpop.eup %1535 }
 0x11a   : > { %v1538_v61 = vpop.eup %1537 }
 0x11b   : > { %v1540_v3 = vpop.eup %1539 }
 0x11c   : > { %v1542_v9 = vpop.eup %1541 }
 0x155   : > { %v1309_v54 = vpop.f32.mrf.mxu0 }
 0x157   : > { %v1310_v56 = vpop.f32.mrf.mxu0 }
 0x158   : > { %v1311_v57 = vadd.f32 %v1310_v56, %v1309_v54  ;;  %v1531_v54 = vld [vmem:[#allocation10 + $0x14] ss:$8 sps:$4 sm:$0xff]   ;;  %v1529_v56 = vld [vmem:[#allocation10 + $0x10] ss:$8 sps:$4 sm:$0xff]  }
 0x159   : > { %v1312_v58 = vpop.f32.mrf.mxu0 }
 0x15a   : > { %v642_v59 = vmul.f32 %v1536_v55, %v1311_v57  ;;  %v1782_v55 = vmov 0   ;;  %v1534_v57 = vld [vmem:[#allocation10 + $0x4] ss:$8 sps:$4 sm:$0xff]  }
 0x15b   : > { %v1313_v62 = vpop.f32.mrf.mxu0 }
 0x15c   : > { %v1314_v63 = vadd.f32 %v1313_v62, %v1312_v58  ;;  %v653_v0 = vadd.f32 %v1248_v60, %v642_v59  ;;  %v1532_v58 = vld [vmem:[#allocation10] ss:$8 sps:$4 sm:$0xff]  }
 0x15d   : > { %v1315_v1 = vpop.f32.mrf.mxu0 }
 0x15e   : > { %v643_v2 = vmul.f32 %v1538_v61, %v1314_v63  ;;  %1543 = vtanh.f32 %v653_v0  ;;  %v1258_v61 = vld [vmem:[%s2073_s6] ss:$0 sm:$0xff] }
 0x15f   : > { %v1316_v4 = vpop.f32.mrf.mxu0 }
 0x160   : > { %v654_v5 = vadd.f32 %v1248_v60, %v643_v2  ;;  %v1317_v6 = vadd.f32 %v1316_v4, %v1315_v1 }
 0x161   : > { %v1318_v7 = vpop.f32.mrf.mxu0 }
 0x162   : > { %1545 = vtanh.f32 %v654_v5  ;;  %v644_v8 = vmul.f32 %v1540_v3, %v1317_v6 }
 0x163   : > { %v1319_v10 = vpop.f32.mrf.mxu0 }
 0x164   : > { %v1320_v11 = vadd.f32 %v1319_v10, %v1318_v7  ;;  %v655_v12 = vadd.f32 %v1248_v60, %v644_v8  ;;  %v933_v10 = vlaneseq }
 0x166   : > { %v645_v13 = vmul.f32 %v1542_v9, %v1320_v11  ;;  %1547 = vtanh.f32 %v655_v12  ;;  %v934_v11 = vshrl.u32 %v933_v10, 7 }
 0x168   : > { %v656_v14 = vadd.f32 %v1248_v60, %v645_v13  ;;  %v935_v12 = vsub.s32 0, %v934_v11  ;;  %v931_v13 = vld [vmem:[%s2075_s8] sm:$0x3] }
 0x16a   : > { %1549 = vtanh.f32 %v656_v14  ;;  %v939_v14 = vsub.s32 1, %v934_v11 }
 0x16b   : > { %v1544_v15 = vpop.eup %1543 }
 0x16f   : > { %v1546_v16 = vpop.eup %1545 }
 0x170   : > { %v661_v17 = vpack.c.bf16 %v1546_v16, %v1544_v15  ;;  %v936_v15 = vrot.slane %v931_v13, %v935_v12  ;;  %v940_v16 = vrot.slane %v931_v13, %v939_v14 }
 0x172   : > { %1357 = vmatprep.mubr.bf16.mxu1 %v661_v17 }
 0x173   : > { %v1548_v18 = vpop.eup %1547 }
 0x177   : > { %v1550_v19 = vpop.eup %1549 }
 0x178   : > { %v662_v20 = vpack.c.bf16 %v1550_v19, %v1548_v18 }
 0x17a   : > { %1358 = vmatmul.mubr.bf16.vlgmr.msra.gmra.mxu1 %v662_v20 }
 0x17b   : > { %1024 = vmatpush1.bf16.msra.mxu1 %v1511_v27  ;;  %1055 = vmatprep.mubr.bf16.mxu1 %v1782_v55 }
 0x17c   : > { %1025 = vmatprep.subr.bf16.mxu1 %v1516_v29 }
 0x17f   : > { %1026 = vmatpush1.bf16.msra.mxu1 %v1514_v30 }
 0x180   : > { %1027 = vmatprep.subr.bf16.mxu1 %v1519_v46 }
 0x183   : > { %1028 = vmatpush1.bf16.msra.mxu1 %v1517_v47 }
 0x184   : > { %1029 = vmatprep.subr.bf16.mxu1 %v1522_v48 }
 0x187   : > { %1030 = vmatpush1.bf16.msra.mxu1 %v1520_v49 }
 0x188   : > { %1031 = vmatprep.subr.bf16.mxu1 %v1525_v50 }
 0x18b   : > { %1032 = vmatpush1.bf16.msra.mxu1 %v1523_v51 }
 0x18c   : > { %1033 = vmatprep.subr.bf16.mxu1 %v1528_v52 }
 0x18f   : > { %1034 = vmatpush1.bf16.msra.mxu1 %v1526_v53 }
 0x190   : > { %1035 = vmatprep.subr.bf16.mxu1 %v1531_v54 }
 0x193   : > { %1036 = vmatpush1.bf16.msra.mxu1 %v1529_v56 }
 0x194   : > { %1037 = vmatprep.subr.bf16.mxu1 %v1534_v57 }
 0x197   : > { %1038 = vmatpush1.bf16.msra.mxu1 %v1532_v58 }
 0x23a   : > { %v1359_v31 = vpop.f32.mrf.mxu1 }
 0x23b   : > { %v777_v37 = vadd.f32 %v1359_v31, %v1249_v32 }
 0x23c   : > { %v768_v33 = vpop.f32.mrf.mxu1 }
 0x23d   : > { %v769_v34 = vadd.f32 %v1249_v32, %v768_v33 }
 0x23e   : > { %v1360_v35 = vpop.f32.mrf.mxu1 }
 0x23f   : > { %v780_v36 = vadd.f32 %v1360_v35, %v1249_v32  ;;  %1551 = vtanh.f32 %v769_v34 }
 0x240   : > { %v771_v38 = vpop.f32.mrf.mxu1 }
 0x241   : > { %v772_v39 = vadd.f32 %v1249_v32, %v771_v38  ;;  %1553 = vtanh.f32 %v780_v36 }
 0x243   : > { %1555 = vtanh.f32 %v772_v39 }
 0x244   : > { %1557 = vtanh.f32 %v777_v37 }
 0x24c   : > { %v1552_v40 = vpop.eup %1551 }
 0x24e   : > { %v1554_v41 = vpop.eup %1553 }
 0x250   : > { %v1556_v42 = vpop.eup %1555 }
 0x251   : > { %v1558_v43 = vpop.eup %1557  ;;  %v787_v44 = vpack.c.bf16 %v1556_v42, %v1552_v40 }
 0x252   : > { %v788_v45 = vpack.c.bf16 %v1554_v41, %v1558_v43 }
 0x253   : > { %1377 = vmatprep.mubr.bf16.mxu0 %v787_v44 }
 0x254   : > { %1378 = vmatmul.mubr.bf16.vlgmr.msra.gmra.mxu0 %v788_v45 }
 0x314   : > { %v1379_v59 = vpop.f32.mrf.mxu0 }
 0x315   : > { %v903_v3 = vadd.f32 %v1379_v59, %v1258_v61 }
 0x316   : > { %v894_v60 = vpop.f32.mrf.mxu0 }
 0x317   : > { %v895_v62 = vadd.f32 %v1258_v61, %v894_v60 }
 0x318   : > { %v1380_v63 = vpop.f32.mrf.mxu0 }
 0x319   : > { %1559 = vtanh.f32 %v895_v62  ;;  %v906_v2 = vadd.f32 %v1380_v63, %v1258_v61 }
 0x31a   : > { %v897_v0 = vpop.f32.mrf.mxu0 }
 0x31b   : > { %v898_v1 = vadd.f32 %v1258_v61, %v897_v0 }
 0x31d   : > { %1561 = vtanh.f32 %v898_v1 }
 0x31e   : > { %1563 = vtanh.f32 %v906_v2 }
 0x31f   : > { %1565 = vtanh.f32 %v903_v3 }
 0x326   : > { %v1560_v4 = vpop.eup %1559 }
 0x32a   : > { %v1562_v5 = vpop.eup %1561 }
 0x32b   : > { %v913_v6 = vpack.c.bf16 %v1562_v5, %v1560_v4  ;;  %v1564_v7 = vpop.eup %1563 }
 0x32c   : > { %v1566_v8 = vpop.eup %1565 }
 0x32d   : > { %1056 = vmatmul.mubr.bf16.vlgmr.msra.gmra.mxu1 %v913_v6  ;;  %v914_v9 = vpack.c.bf16 %v1564_v7, %v1566_v8 }
 0x32e   : > { %1065 = vmatprep.mubr.bf16.mxu1 %v1782_v55 }
 0x335   : > { %1066 = vmatmul.mubr.bf16.gmra.mxu1 %v914_v9 }
 0x3ed   : > { %v1057_v17 = vpop.f32.mrf.mxu1 }
 0x3ee   : > { %v1058_v18 = vadd.f32 %v1057_v17, %v936_v15 }
 0x3ef   : > { %v1059_v19 = vpop.f32.mrf.mxu1 }
 0x3f0   : > { %1076 = vst [vmem:[%s409_s1] sm:$0xff] %v1058_v18  ;;  %v1060_v20 = vadd.f32 %v1059_v19, %v940_v16 }
 0x3f1   : > { %v1061_v21 = vpop.f32.mrf.mxu1 }
 0x3f2   : > { %1077 = vst [vmem:[%s409_s1 + $0x8] sm:$0xff] %v1060_v20  ;;  %v1062_v22 = vadd.f32 %v1061_v21, %v936_v15 }
 0x3f3   : > { %v1063_v23 = vpop.f32.mrf.mxu1 }
 0x3f4   : > { %1078 = vst [vmem:[%s409_s1 + $0x10] sm:$0xff] %v1062_v22  ;;  %v1064_v24 = vadd.f32 %v1063_v23, %v940_v16 }
 0x3f5   : > { %v1067_v25 = vpop.f32.mrf.mxu1 }
 0x3f6   : > { %1079 = vst [vmem:[%s409_s1 + $0x18] sm:$0xff] %v1064_v24  ;;  %v1068_v26 = vadd.f32 %v1067_v25, %v936_v15 }
 0x3f7   : > { %v1069_v27 = vpop.f32.mrf.mxu1 }
 0x3f8   : > { %1080 = vst [vmem:[%s409_s1 + $0x20] sm:$0xff] %v1068_v26  ;;  %v1070_v28 = vadd.f32 %v1069_v27, %v940_v16 }
 0x3f9   : > { %v1071_v29 = vpop.f32.mrf.mxu1 }
 0x3fa   : > { %1081 = vst [vmem:[%s409_s1 + $0x28] sm:$0xff] %v1070_v28  ;;  %v1072_v30 = vadd.f32 %v1071_v29, %v936_v15 }
 0x3fb   : > { %v1073_v31 = vpop.f32.mrf.mxu1 }
 0x3fc   : > { %1082 = vst [vmem:[%s409_s1 + $0x30] sm:$0xff] %v1072_v30  ;;  %v1074_v32 = vadd.f32 %v1073_v31, %v940_v16 }
 0x3fe   : > { %1083 = vst [vmem:[%s409_s1 + $0x38] sm:$0xff] %v1074_v32 }
 0x3ff   : > { %1712 = shalt.err (!%p1709_p5)
}
 0x400   : > { %s1713_s19 = scalar_lea.hbm %s2025_s15, 1024  ;;  %s1717_s28 = scalar_lea.hbm %s2076_s9, 4096 }
 0x401   : > { %p1714_p0 = scmp.ne.s32.totalorder %s2025_s15, %s1713_s19  ;;  %p1718_p10 = scmp.lt.s32.totalorder %s2025_s15, %s2076_s9 }
 0x402   : > { %p1719_p4 = scmp.lt.s32.totalorder %s1717_s28, %s1713_s19 }
 0x403   : > { %p1715_p8 = pnand %p1714_p0, %p2104_p1 }
 0x404   : > { %p1720_p7 = por %p1719_p4, %p1718_p10 }
 0x405   : > { %p1716_p6 = pneg %p1715_p8 }
 0x407   : > { %p1721_p11 = pnand %p1720_p7, %p1716_p6 }
 0x409   : > { %1724 = shalt.err (!%p1721_p11)
}
 0x40a   : > { %s1784_s22 = smov 256   ;;  %s1785_s26 = smov 16  }
 0x40b   : > { %1399 = dma.vmem_to_hbm [thread:$0]  (%p2104_p1), %s2020_s29, 1024, %s2025_s15, %s1085_s17, %s1784_s22, %s1784_s22, %s1785_s26  }
 0x40c PF: > { %p1431_p9 = scmp.ge.s32.totalorder %s1771_s12, 2  ;;  %s1114_s14 = sand.u32 1, %s1759_s30  }
 0x40d   : > { %p2105_p12 = scmp.ne.s32.totalorder %s2087_s16, 0  ;;  %s1115_s13 = scalar_lea.sflag [#allocation4], %s1114_s14 }
 0x40f   : > { %p1419_p2 = pnand %p1431_p9, %p2105_p12 }
 0x411   : > { %p1420_p13 = pneg %p1419_p2 }
 0x413   : > { %1754 = dma.done.wait (%p1420_p13), %s1115_s13, 1024  }
 0x414   : > { %1756 = vsyncadd (%p1420_p13), %s1115_s13, 4294966272  ;;  %p24_p3 = scmp.ge.s32.totalorder %s1926_s18, 6   ;;  %s2106_s30 = smov %s1763_s10 }
 0x415   : > { %s2107_s10 = smov %s1767_s11  ;;  %s2108_s11 = smov %s1935_s23 }
 0x416   : > { %s2109_s12 = smov %s1926_s18  ;;  %26 = sbr.rel (!%p24_p3) target bundleno = 11 (0xb), region = 117 }
 0x41b   :  { %1120 = vsyncpa [#allocation3], 1 }
 0x41c   :  { %1122 = vsyncpa [#allocation3 + $0x1], 1 }
 0x41d   :  { %1123 = vsyncpa [#allocation6], 1 }
 0x41e   :  { %1124 = vsyncpa [#allocation9], 1 }
 0x41f   :  { %1125 = vsyncpa [#allocation4], 1 }
 0x420   :  { %1127 = vsyncpa [#allocation4 + $0x1], 1 }

</bundles_post_ra>
